<compile_context>
chip_gen: v5e
topology: v5e:2x2
jax: 0.10.0
libtpu: 0.0.40
codegen_flags: <defaults>
</compile_context>

<pallas_src>
import functools

import jax
import jax.numpy as jnp
from jax.experimental import pallas as pl
from jax.experimental.pallas import tpu as pltpu


def _round_up(x, m):
    return ((x + m - 1) // m) * m


# ---------------------------------------------------------------------------
# Pallas kernel: one batch image per grid step.
#   out[n, :oc, :] = leaky_relu( (patches @ W + b).T )[:oc]
# where patches is the (OH*OW, C*KH*KW) im2col block built in VMEM.
# ---------------------------------------------------------------------------
def _conv_kernel(x_ref, w_ref, b_ref, o_ref, *, kh, kw, oh, ow, stride, oc,
                 use_relu, slope):
    # x_ref: (1, HP, WP, C)        NHWC, spatially pre-padded
    # w_ref: (KH*KW*C, OC_pad)     flattened weights (zero-padded OC)
    # b_ref: (1, OC_pad)
    # o_ref: (1, OC, OH*OW)        unpadded, lane-dense output block
    c = x_ref.shape[-1]
    m = oh * ow

    # im2col in VMEM: shifted windows concatenated along the channel axis so
    # the whole conv is ONE matmul with K = C*KH*KW (in-MXU accumulation).
    cols = []
    for i in range(kh):
        for j in range(kw):
            if stride == 1:
                win = x_ref[0, i:i + oh, j:j + ow, :]             # (OH, OW, C)
            else:
                # strided ref load (no over-read + host-side subsample)
                win = x_ref[0, pl.ds(i, oh, stride), pl.ds(j, ow, stride), :]
            cols.append(win.reshape(m, c))
    patches = jnp.concatenate(cols, axis=-1)                      # (M, C*KH*KW)

    acc = jnp.dot(patches, w_ref[...],
                  preferred_element_type=jnp.float32)             # (M, OC_pad)
    acc = acc + b_ref[...].astype(jnp.float32)
    if use_relu:
        acc = jnp.maximum(acc, slope * acc)                       # LeakyReLU

    # (M, OC_pad) -> (OC, M): transpose in-kernel so the HBM output is the
    # unpadded slab (N, OC, OH*OW); NCHW is then a free wrapper reshape.
    o_ref[0] = jnp.transpose(acc)[:oc, :].astype(o_ref.dtype)


# ---------------------------------------------------------------------------
# Wrapper: full Conv2d forward (conv + optional LeakyReLU(0.1)), NCHW API.
# ---------------------------------------------------------------------------
def conv2d_forward(x, weight, bias, *, stride=1, relu=True, same_padding=False,
                   compute_dtype=None):
    """x: (N, C, H, W);  weight: (OC, C, KH, KW);  bias: (OC,)."""
    n, c, h, w = x.shape
    oc, wc, kh, kw = weight.shape
    assert wc == c, "channel mismatch"
    pad = (kh - 1) // 2 if same_padding else 0   # PyTorch: int((ks-1)/2)

    hp, wp = h + 2 * pad, w + 2 * pad
    oh = (hp - kh) // stride + 1
    ow = (wp - kw) // stride + 1

    # NCHW -> NHWC (+ spatial zero pad). Single pass over the 1x-sized input;
    # the KH*KW patch expansion itself never touches HBM.
    x_nhwc = jnp.transpose(x, (0, 2, 3, 1))
    if pad:
        x_nhwc = jnp.pad(x_nhwc, ((0, 0), (pad, pad), (pad, pad), (0, 0)))

    # Weights flattened to (KH*KW*C, OC_pad); OC padded to a lane multiple
    # only for the VMEM matmul (HBM output stays unpadded).
    oc_pad = _round_up(oc, 128)
    w_flat = jnp.transpose(weight, (2, 3, 1, 0)).reshape(kh * kw * c, oc)
    w_flat = jnp.pad(w_flat, ((0, 0), (0, oc_pad - oc)))
    b_flat = jnp.pad(bias, (0, oc_pad - oc)).reshape(1, oc_pad)

    out_dtype = compute_dtype if compute_dtype is not None else x.dtype
    if compute_dtype is not None:   # e.g. jnp.bfloat16 on v5e/v6e/v7x
        x_nhwc = x_nhwc.astype(compute_dtype)
        w_flat = w_flat.astype(compute_dtype)

    kernel = functools.partial(
        _conv_kernel, kh=kh, kw=kw, oh=oh, ow=ow, stride=stride, oc=oc,
        use_relu=relu, slope=0.1)

    out = pl.pallas_call(
        kernel,
        out_shape=jax.ShapeDtypeStruct((n, oc, oh * ow), out_dtype),
        grid_spec=pltpu.PrefetchScalarGridSpec(
            num_scalar_prefetch=0,
            grid=(n,),
            in_specs=[
                # one full (padded) image per grid step
                pl.BlockSpec((1, hp, wp, c), lambda i: (i, 0, 0, 0)),
                # grid-invariant weights / bias
                pl.BlockSpec((kh * kw * c, oc_pad), lambda i: (0, 0)),
                pl.BlockSpec((1, oc_pad), lambda i: (0, 0)),
            ],
            out_specs=pl.BlockSpec((1, oc, oh * ow), lambda i: (i, 0, 0)),
        ),
        compiler_params=pltpu.CompilerParams(
            dimension_semantics=("parallel",),
            # Safe on every chip (<= 48 MiB keeps headroom under v7x's 64 MiB
            # physical VMEM; well below v5e/v6e's 128 MiB).
            vmem_limit_bytes=48 * 1024 * 1024,
        ),
    )(x_nhwc, w_flat, b_flat)

    # (N, OC, OH*OW) -> (N, OC, OH, OW): free reshape, no transpose pass.
    return out.reshape(n, oc, oh, ow)


# ---------------------------------------------------------------------------
# Reference (pure JAX) for a correctness check
# ---------------------------------------------------------------------------
def _reference(x, weight, bias, *, stride, relu, same_padding):
    kh = weight.shape[2]
    padding = (kh - 1) // 2 if same_padding else 0
    y = jax.lax.conv_general_dilated(
        x, weight, window_strides=(stride, stride),
        padding=((padding, padding), (padding, padding)),
        dimension_numbers=("NCHW", "OIHW", "NCHW"),
    )
    y = y + bias.reshape(1, -1, 1, 1)
    if relu:
        y = jnp.where(y >= 0.0, y, 0.1 * y)
    return y


if __name__ == "__main__":
    # Module config: Conv2d(in_channels=4, out_channels=8, kernel_size=3,
    #                       stride=1, relu=True, same_padding=True)
    in_channels, out_channels, ksize, stride = 4, 8, 3, 1
    relu, same_padding = True, True

    key = jax.random.PRNGKey(0)
    kx, kw_, kb = jax.random.split(key, 3)

    x = jax.random.normal(kx, (2, in_channels, 16, 16), dtype=jnp.float32)

    # Deterministic parameter init (PyTorch-style uniform bound = 1/sqrt(fan_in)).
    fan_in = in_channels * ksize * ksize
    bound = 1.0 / (fan_in ** 0.5)
    weight = jax.random.uniform(
        kw_, (out_channels, in_channels, ksize, ksize),
        minval=-bound, maxval=bound, dtype=jnp.float32)
    bias = jax.random.uniform(
        kb, (out_channels,), minval=-bound, maxval=bound, dtype=jnp.float32)

    out = conv2d_forward(x, weight, bias, stride=stride, relu=relu,
                         same_padding=same_padding)
    out = jax.block_until_ready(out)

    ref = _reference(x, weight, bias, stride=stride, relu=relu,
                     same_padding=same_padding)
    assert out.shape == ref.shape == (2, out_channels, 16, 16)
    assert jnp.allclose(out, ref, atol=1e-4, rtol=1e-4), "mismatch vs reference"

    print("KERNEL_OK")
</pallas_src>

<mosaic_0001>
module attributes {stable_mosaic.version = 11 : i64} {
  func.func @_conv_kernel(%arg0: i32, %arg1: memref<1x18x18x4xf32, #tpu.memory_space<vmem>>, %arg2: memref<36x128xf32, #tpu.memory_space<vmem>>, %arg3: memref<1x128xf32, #tpu.memory_space<vmem>>, %arg4: memref<1x8x256xf32, #tpu.memory_space<vmem>>) attributes {dimension_semantics = [#tpu.dimension_semantics<parallel>], iteration_bounds = array<i64: 2>, scalar_prefetch = 0 : i64, scratch_operands = 0 : i64, tpu.core_type = #tpu.core_type<tc>, window_params = [{transform_indices = @transform_0, window_bounds = array<i64: 1, 18, 18, 4>}, {pipeline_mode = #tpu.pipeline_mode<synchronous>, transform_indices = @transform_1, window_bounds = array<i64: 36, 128>}, {pipeline_mode = #tpu.pipeline_mode<synchronous>, transform_indices = @transform_2, window_bounds = array<i64: 1, 128>}, {transform_indices = @transform_3, window_bounds = array<i64: 1, 8, 256>}]} {
    %c0 = arith.constant 0 : index
    %c0_0 = arith.constant 0 : index
    %c0_1 = arith.constant 0 : index
    %c0_2 = arith.constant 0 : index
    %0 = vector.load %arg1[%c0, %c0_0, %c0_1, %c0_2] : memref<1x18x18x4xf32, #tpu.memory_space<vmem>>, vector<1x16x16x4xf32>
    %1 = vector.shape_cast %0 : vector<1x16x16x4xf32> to vector<16x16x4xf32>
    %2 = vector.shape_cast %1 : vector<16x16x4xf32> to vector<256x4xf32>
    %c0_3 = arith.constant 0 : index
    %c0_4 = arith.constant 0 : index
    %c1 = arith.constant 1 : index
    %c0_5 = arith.constant 0 : index
    %3 = vector.load %arg1[%c0_3, %c0_4, %c1, %c0_5] : memref<1x18x18x4xf32, #tpu.memory_space<vmem>>, vector<1x16x16x4xf32>
    %4 = vector.shape_cast %3 : vector<1x16x16x4xf32> to vector<16x16x4xf32>
    %5 = vector.shape_cast %4 : vector<16x16x4xf32> to vector<256x4xf32>
    %c0_6 = arith.constant 0 : index
    %c0_7 = arith.constant 0 : index
    %c2 = arith.constant 2 : index
    %c0_8 = arith.constant 0 : index
    %6 = vector.load %arg1[%c0_6, %c0_7, %c2, %c0_8] : memref<1x18x18x4xf32, #tpu.memory_space<vmem>>, vector<1x16x16x4xf32>
    %7 = vector.shape_cast %6 : vector<1x16x16x4xf32> to vector<16x16x4xf32>
    %8 = vector.shape_cast %7 : vector<16x16x4xf32> to vector<256x4xf32>
    %c0_9 = arith.constant 0 : index
    %c1_10 = arith.constant 1 : index
    %c0_11 = arith.constant 0 : index
    %c0_12 = arith.constant 0 : index
    %9 = vector.load %arg1[%c0_9, %c1_10, %c0_11, %c0_12] : memref<1x18x18x4xf32, #tpu.memory_space<vmem>>, vector<1x16x16x4xf32>
    %10 = vector.shape_cast %9 : vector<1x16x16x4xf32> to vector<16x16x4xf32>
    %11 = vector.shape_cast %10 : vector<16x16x4xf32> to vector<256x4xf32>
    %c0_13 = arith.constant 0 : index
    %c1_14 = arith.constant 1 : index
    %c1_15 = arith.constant 1 : index
    %c0_16 = arith.constant 0 : index
    %12 = vector.load %arg1[%c0_13, %c1_14, %c1_15, %c0_16] : memref<1x18x18x4xf32, #tpu.memory_space<vmem>>, vector<1x16x16x4xf32>
    %13 = vector.shape_cast %12 : vector<1x16x16x4xf32> to vector<16x16x4xf32>
    %14 = vector.shape_cast %13 : vector<16x16x4xf32> to vector<256x4xf32>
    %c0_17 = arith.constant 0 : index
    %c1_18 = arith.constant 1 : index
    %c2_19 = arith.constant 2 : index
    %c0_20 = arith.constant 0 : index
    %15 = vector.load %arg1[%c0_17, %c1_18, %c2_19, %c0_20] : memref<1x18x18x4xf32, #tpu.memory_space<vmem>>, vector<1x16x16x4xf32>
    %16 = vector.shape_cast %15 : vector<1x16x16x4xf32> to vector<16x16x4xf32>
    %17 = vector.shape_cast %16 : vector<16x16x4xf32> to vector<256x4xf32>
    %c0_21 = arith.constant 0 : index
    %c2_22 = arith.constant 2 : index
    %c0_23 = arith.constant 0 : index
    %c0_24 = arith.constant 0 : index
    %18 = vector.load %arg1[%c0_21, %c2_22, %c0_23, %c0_24] : memref<1x18x18x4xf32, #tpu.memory_space<vmem>>, vector<1x16x16x4xf32>
    %19 = vector.shape_cast %18 : vector<1x16x16x4xf32> to vector<16x16x4xf32>
    %20 = vector.shape_cast %19 : vector<16x16x4xf32> to vector<256x4xf32>
    %c0_25 = arith.constant 0 : index
    %c2_26 = arith.constant 2 : index
    %c1_27 = arith.constant 1 : index
    %c0_28 = arith.constant 0 : index
    %21 = vector.load %arg1[%c0_25, %c2_26, %c1_27, %c0_28] : memref<1x18x18x4xf32, #tpu.memory_space<vmem>>, vector<1x16x16x4xf32>
    %22 = vector.shape_cast %21 : vector<1x16x16x4xf32> to vector<16x16x4xf32>
    %23 = vector.shape_cast %22 : vector<16x16x4xf32> to vector<256x4xf32>
    %c0_29 = arith.constant 0 : index
    %c2_30 = arith.constant 2 : index
    %c2_31 = arith.constant 2 : index
    %c0_32 = arith.constant 0 : index
    %24 = vector.load %arg1[%c0_29, %c2_30, %c2_31, %c0_32] : memref<1x18x18x4xf32, #tpu.memory_space<vmem>>, vector<1x16x16x4xf32>
    %25 = vector.shape_cast %24 : vector<1x16x16x4xf32> to vector<16x16x4xf32>
    %26 = vector.shape_cast %25 : vector<16x16x4xf32> to vector<256x4xf32>
    %27 = tpu.concatenate %2, %5, %8, %11, %14, %17, %20, %23, %26 in 1 : vector<256x4xf32>, vector<256x4xf32>, vector<256x4xf32>, vector<256x4xf32>, vector<256x4xf32>, vector<256x4xf32>, vector<256x4xf32>, vector<256x4xf32>, vector<256x4xf32> -> vector<256x36xf32>
    %c0_33 = arith.constant 0 : index
    %c0_34 = arith.constant 0 : index
    %28 = vector.load %arg2[%c0_33, %c0_34] : memref<36x128xf32, #tpu.memory_space<vmem>>, vector<36x128xf32>
    %cst = arith.constant dense<0.000000e+00> : vector<256x128xf32>
    %29 = tpu.matmul %27, %28, %cst {dimension_numbers = #tpu.dot_dimension_numbers<[1], [0], [0], [1], [0, 0, 1, 1], [], []>} : vector<256x36xf32>, vector<36x128xf32>, vector<256x128xf32> -> vector<256x128xf32>
    %c0_35 = arith.constant 0 : index
    %c0_36 = arith.constant 0 : index
    %30 = vector.load %arg3[%c0_35, %c0_36] : memref<1x128xf32, #tpu.memory_space<vmem>>, vector<1x128xf32>
    %31 = vector.broadcast %30 : vector<1x128xf32> to vector<256x128xf32>
    %32 = arith.addf %29, %31 : vector<256x128xf32>
    %cst_37 = arith.constant 1.000000e-01 : f32
    %33 = vector.broadcast %cst_37 : f32 to vector<256x128xf32>
    %34 = arith.mulf %33, %32 : vector<256x128xf32>
    %35 = arith.maximumf %32, %34 : vector<256x128xf32>
    %36 = tpu.transpose %35, [1, 0] : vector<256x128xf32> -> vector<128x256xf32>
    %37 = vector.extract_strided_slice %36 {offsets = [0, 0], sizes = [8, 256], strides = [1, 1]} : vector<128x256xf32> to vector<8x256xf32>
    %c0_38 = arith.constant 0 : index
    %c0_39 = arith.constant 0 : index
    %c0_40 = arith.constant 0 : index
    %38 = vector.load %arg4[%c0_38, %c0_39, %c0_40] : memref<1x8x256xf32, #tpu.memory_space<vmem>>, vector<1x8x256xf32>
    %39 = vector.shape_cast %38 : vector<1x8x256xf32> to vector<8x256xf32>
    %40 = vector.shape_cast %37 : vector<8x256xf32> to vector<1x8x256xf32>
    tpu.vector_store %arg4[%c0_38, %c0_39, %c0_40], %40 {strides = array<i32>} : memref<1x8x256xf32, #tpu.memory_space<vmem>>, vector<1x8x256xf32>,
    return
  }
  func.func @transform_0(%arg0: i32) -> (i32, i32, i32, i32) {
    %c0_i32 = arith.constant 0 : i32
    %c0_i32_0 = arith.constant 0 : i32
    %c0_i32_1 = arith.constant 0 : i32
    %c0_i32_2 = arith.constant 0 : i32
    return %arg0, %c0_i32, %c0_i32_0, %c0_i32_1 : i32, i32, i32, i32
  }
  func.func @transform_1(%arg0: i32) -> (i32, i32) {
    %c0_i32 = arith.constant 0 : i32
    %c0_i32_0 = arith.constant 0 : i32
    %c0_i32_1 = arith.constant 0 : i32
    return %c0_i32, %c0_i32_0 : i32, i32
  }
  func.func @transform_2(%arg0: i32) -> (i32, i32) {
    %c0_i32 = arith.constant 0 : i32
    %c0_i32_0 = arith.constant 0 : i32
    %c0_i32_1 = arith.constant 0 : i32
    return %c0_i32, %c0_i32_0 : i32, i32
  }
  func.func @transform_3(%arg0: i32) -> (i32, i32, i32) {
    %c0_i32 = arith.constant 0 : i32
    %c0_i32_0 = arith.constant 0 : i32
    %c0_i32_1 = arith.constant 0 : i32
    return %arg0, %c0_i32, %c0_i32_0 : i32, i32, i32
  }
}

</mosaic_0001>

<bundles_post_ra>
// kernel: tpu_custom_call.1
= control target key start
LH: loop header
LB: loop body
LE: loop exit
PB: predicated region body
PF: predicated region fallthrough
CT: control target
= control target key end

     0   :  { %8 = vsyncpa [#allocation3], 0  ;;  %s4412_s0 = inlined_call_operand.vmem [shape: f32[2,18,18,4], index: 0, kind: input, shape index: {}]   ;;  %s4413_s1 = inlined_call_operand.vmem [shape: f32[36,128], index: 1, kind: input, shape index: {}]   ;;  %s4414_s2 = inlined_call_operand.vmem [shape: f32[1,128], index: 2, kind: input, shape index: {}]   ;;  %s4415_s3 = inlined_call_operand.hbm [shape: f32[2,8,256], index: 3, kind: output, shape index: {}]  }
   0x1   :  { %10 = vsyncpa [#allocation3 + $0x1], 0  ;;  %s2574_s12 = smov 0   ;;  %s2576_s13 = smov 0  }
   0x2   :  { %s2578_s14 = smov 0   ;;  %s2580_s15 = smov 0  }
   0x3 LB: > { %s2595_s16 = sadd.s32 4294967295, %s2544_s15   ;;  %s2176_s17 = sadd.s32 4294967294, %s2544_s15   ;;  %s2544_s15 = sphi %s2580_s15, %s4734_s15   ;;  %s2540_s14 = sphi %s2578_s14, %s4733_s14   ;;  %s2536_s13 = sphi %s2576_s13, %s4732_s13   ;;  %s2532_s12 = sphi %s2574_s12, %s4731_s12  }
   0x4   : > { %s2599_s18 = sadd.s32 1, %s2544_s15   ;;  %s91_s19 = sadd.s32 1, %s2540_s14 }
   0x5   : > { %s88_s20 = ssub.s32 %s2544_s15, %s2599_s18  ;;  %p101_p0 = scmp.ne.s32.totalorder %s2540_s14, %s2536_s13 }
   0x6   : > { %p89_p1 = scmp.eq.s32.totalorder %s88_s20, 0  ;;  %p102_p2 = scmp.eq.s32.totalorder %s2595_s16, 1 }
   0x7   : > { %p107_p3 = scmp.ne.s32.totalorder %s2536_s13, %s2532_s12  ;;  %p108_p4 = scmp.eq.s32.totalorder %s2176_s17, 1 }
   0x8   : > { %s2610_s21 = scalar_select %p89_p1, %s2540_s14, %s91_s19  }
   0x9   : > { %p2612_p5 = por %p102_p2, %p101_p0  ;;  %p2616_p6 = por %p108_p4, %p107_p3 }
   0xa   : > { %p2179_p7 = scmp.ge.s32.totalorder %s2544_s15, 1  ;;  %p140_p8 = scmp.lt.s32.totalorder %s2544_s15, 3 }
   0xc   : > { %p141_p9 = pnand %p2179_p7, %p140_p8 }
   0xe   : > { %144 = sbr.rel (%p141_p9) target bundleno = 1019 (0x3fb), region = 32 }
  0x13   : > { %p164_p10 = scmp.lt.s32.totalorder %s2595_s16, 1  ;;  %s2546_s29 = smov 4   ;;  %vm1483_vm0 = vcmask 31744   ;;  %vm1516_vm1 = vcmask 64512   ;;  %vm1549_vm2 = vcmask 97280   ;;  %vm1582_vm3 = vcmask 130048  }
  0x14   : > { %s2547_s30 = smov 8   ;;  %s2548_s4 = smov 12   ;;  %vm1615_vm4 = vcmask 162816   ;;  %vm1648_vm5 = vcmask 195584   ;;  %vm1853_vm6 = vcmask 1043456   ;;  %vm1681_vm7 = vcmask 228352  }
  0x15   : > { %s165_s24 = scalar_select %p164_p10, %s2595_s16, 1  ;;  %vm1714_vm8 = vcmask 261120   ;;  %vm1756_vm9 = vcmask 293888  }
  0x16   : > { %s2549_s5 = smov 16   ;;  %s2550_s6 = smov 20  }
  0x17   : > { %s2428_s25 = smul.u32 432, %s165_s24  ;;  %s2551_s7 = smov 24  }
  0x18   : > { %s2552_s8 = smov 28   ;;  %s2553_s9 = smov 32  }
  0x19   : > { %s2627_s28 = scalar_lea.vmem %s4412_s0, %s2428_s25  ;;  %s2502_s26 = scalar_lea.hbm %s4415_s3, 32 }
  0x1a   : > { %v2630_v0 = vld [vmem:[%s2627_s28 + $0x31] sm:$0xff]  ;;  %v2633_v1 = vld [vmem:[%s2627_s28 + $0x19] sm:$0xff]  ;;  %v201_v2 = vld [vmem:[%s2627_s28 + $0x1] sm:$0xff] }
  0x1b   : > { %499 = vrot.lane.b32.xlu2 %v2630_v0, %s2546_s29  ;;  %495 = vrot.lane.b32.xlu1 %v2633_v1, %s2546_s29  ;;  %v2642_v3 = vld [vmem:[%s2627_s28 + $0x39] sm:$0xff]  ;;  %v2645_v4 = vld [vmem:[%s2627_s28 + $0x21] sm:$0xff] }
  0x1c   : > { %491 = vrot.lane.b32.xlu0 %v201_v2, %s2546_s29  ;;  %v202_v5 = vld [vmem:[%s2627_s28 + $0x9] sm:$0xff]  ;;  %v2654_v6 = vld [vmem:[%s2627_s28 + $0x61] sm:$0xff]  ;;  %v2657_v7 = vld [vmem:[%s2627_s28 + $0x51] sm:$0xff] }
  0x1d   : > { %v2660_v8 = vld [vmem:[%s2627_s28 + $0x49] sm:$0xff]  ;;  %v2669_v9 = vld [vmem:[%s2627_s28 + $0x81] sm:$0xff]  ;;  %v2672_v10 = vld [vmem:[%s2627_s28 + $0x79] sm:$0xff] }
  0x1e   : > { %v2675_v11 = vld [vmem:[%s2627_s28 + $0x69] sm:$0xff]  ;;  %v2687_v13 = vld [vmem:[%s2627_s28 + $0x99] sm:$0xff]  ;;  %v2690_v14 = vld [vmem:[%s2627_s28 + $0x91] sm:$0xff] }
  0x1f   : > { %v2684_v12 = vld [vmem:[%s2627_s28 + $0xa9] sm:$0xff]  ;;  %v2702_v16 = vld [vmem:[%s2627_s28 + $0xc1] sm:$0xff]  ;;  %v2705_v17 = vld [vmem:[%s2627_s28 + $0xb1] sm:$0xff] }
  0x20   : > { %v2699_v15 = vld [vmem:[%s2627_s28 + $0xc9] sm:$0xff]  ;;  %v2714_v18 = vld [vmem:[%s2627_s28 + $0xf1] sm:$0xff]  ;;  %v2717_v19 = vld [vmem:[%s2627_s28 + $0xe1] sm:$0xff] }
  0x21   : > { %v2720_v20 = vld [vmem:[%s2627_s28 + $0xd9] sm:$0xff]  ;;  %v2729_v21 = vld [vmem:[%s2627_s28 + $0x111] sm:$0xff]  ;;  %v2732_v22 = vld [vmem:[%s2627_s28 + $0x109] sm:$0xff] }
  0x22   : > { %v2735_v23 = vld [vmem:[%s2627_s28 + $0xf9] sm:$0xff]  ;;  %v2747_v25 = vld [vmem:[%s2627_s28 + $0x129] sm:$0xff]  ;;  %v2750_v26 = vld [vmem:[%s2627_s28 + $0x121] sm:$0xff] }
  0x23   : > { %501 = vrot.lane.b32.xlu2 %v2642_v3, %s2546_s29  ;;  %497 = vrot.lane.b32.xlu1 %v2645_v4, %s2546_s29  ;;  %v2744_v24 = vld [vmem:[%s2627_s28 + $0x139] sm:$0xff]  ;;  %v2762_v28 = vld [vmem:[%s2627_s28 + $0x151] sm:$0xff] }
  0x24   : > { %493 = vrot.lane.b32.xlu0 %v202_v5, %s2546_s29  ;;  %v2759_v27 = vld [vmem:[%s2627_s28 + $0x159] sm:$0xff]  ;;  %v2765_v29 = vld [vmem:[%s2627_s28 + $0x141] sm:$0xff]  ;;  %v2775_v31 = vld [vmem:[%s2627_s28 + $0x171] sm:$0xff] }
  0x25   : > { %v233_v30 = vld [vmem:[%s2627_s28 + $0x2] sm:$0xff]  ;;  %v2789_v34 = vld [vmem:[%s2627_s28 + $0x1a] sm:$0xff]  ;;  %v234_v35 = vld [vmem:[%s2627_s28 + $0xa] sm:$0xff] }
  0x26   : > { %v2778_v32 = vld [vmem:[%s2627_s28 + $0x169] sm:$0xff]  ;;  %v2803_v38 = vld [vmem:[%s2627_s28 + $0x3a] sm:$0xff]  ;;  %v2806_v39 = vld [vmem:[%s2627_s28 + $0x32] sm:$0xff] }
  0x27   : > { %v2786_v33 = vld [vmem:[%s2627_s28 + $0x22] sm:$0xff]  ;;  %v2800_v37 = vld [vmem:[%s2627_s28 + $0x4a] sm:$0xff]  ;;  %v2823_v43 = vld [vmem:[%s2627_s28 + $0x52] sm:$0xff] }
  0x28   : > { %v2817_v41 = vld [vmem:[%s2627_s28 + $0x6a] sm:$0xff]  ;;  %v2820_v42 = vld [vmem:[%s2627_s28 + $0x62] sm:$0xff]  ;;  %v2834_v45 = vld [vmem:[%s2627_s28 + $0x92] sm:$0xff] }
  0x29   : > { %v2837_v46 = vld [vmem:[%s2627_s28 + $0x82] sm:$0xff]  ;;  %v2840_v47 = vld [vmem:[%s2627_s28 + $0x7a] sm:$0xff]  ;;  %v2855_v51 = vld [vmem:[%s2627_s28 + $0xb2] sm:$0xff] }
  0x2a   : > { %v2858_v52 = vld [vmem:[%s2627_s28 + $0xaa] sm:$0xff]  ;;  %v2861_v53 = vld [vmem:[%s2627_s28 + $0x9a] sm:$0xff]  ;;  %v2882_v59 = vld [vmem:[%s2627_s28 + $0xc2] sm:$0xff] }
  0x2b   : > { %507 = vrot.lane.b32.xlu2 %v2654_v6, %s2546_s29  ;;  %505 = vrot.lane.b32.xlu1 %v2657_v7, %s2546_s29  ;;  %v2876_v57 = vld [vmem:[%s2627_s28 + $0xda] sm:$0xff]  ;;  %v2879_v58 = vld [vmem:[%s2627_s28 + $0xca] sm:$0xff] }
  0x2c   : > { %503 = vrot.lane.b32.xlu0 %v2660_v8, %s2546_s29  ;;  %v2897_v63 = vld [vmem:[%s2627_s28 + $0xfa] sm:$0xff]  ;;  %v2900_v2 = vld [vmem:[%s2627_s28 + $0xf2] sm:$0xff]  ;;  %v2903_v5 = vld [vmem:[%s2627_s28 + $0xe2] sm:$0xff] }
  0x33   : > { %513 = vrot.lane.b32.xlu2 %v2669_v9, %s2546_s29  ;;  %511 = vrot.lane.b32.xlu1 %v2672_v10, %s2546_s29 }
  0x34   : > { %509 = vrot.lane.b32.xlu0 %v2675_v11, %s2546_s29 }
  0x3b   : > { %519 = vrot.lane.b32.xlu2 %v2684_v12, %s2546_s29  ;;  %517 = vrot.lane.b32.xlu1 %v2687_v13, %s2546_s29 }
  0x3c   : > { %515 = vrot.lane.b32.xlu0 %v2690_v14, %s2546_s29 }
  0x43   : > { %525 = vrot.lane.b32.xlu2 %v2699_v15, %s2546_s29  ;;  %523 = vrot.lane.b32.xlu1 %v2702_v16, %s2546_s29 }
  0x44   : > { %521 = vrot.lane.b32.xlu0 %v2705_v17, %s2546_s29 }
  0x4b   : > { %531 = vrot.lane.b32.xlu2 %v2714_v18, %s2546_s29  ;;  %529 = vrot.lane.b32.xlu1 %v2717_v19, %s2546_s29 }
  0x4c   : > { %527 = vrot.lane.b32.xlu0 %v2720_v20, %s2546_s29 }
  0x53   : > { %537 = vrot.lane.b32.xlu2 %v2729_v21, %s2546_s29  ;;  %535 = vrot.lane.b32.xlu1 %v2732_v22, %s2546_s29 }
  0x54   : > { %533 = vrot.lane.b32.xlu0 %v2735_v23, %s2546_s29 }
  0x5b   : > { %543 = vrot.lane.b32.xlu2 %v2744_v24, %s2546_s29  ;;  %541 = vrot.lane.b32.xlu1 %v2747_v25, %s2546_s29 }
  0x5c   : > { %539 = vrot.lane.b32.xlu0 %v2750_v26, %s2546_s29 }
  0x63   : > { %549 = vrot.lane.b32.xlu2 %v2759_v27, %s2546_s29  ;;  %547 = vrot.lane.b32.xlu1 %v2762_v28, %s2546_s29 }
  0x64   : > { %545 = vrot.lane.b32.xlu0 %v2765_v29, %s2546_s29 }
  0x6b   : > { %619 = vrot.lane.b32.xlu2 %v233_v30, %s2547_s30  ;;  %553 = vrot.lane.b32.xlu1 %v2775_v31, %s2546_s29 }
  0x6c   : > { %551 = vrot.lane.b32.xlu0 %v2778_v32, %s2546_s29 }
  0x73   : > { %625 = vrot.lane.b32.xlu2 %v2786_v33, %s2547_s30  ;;  %623 = vrot.lane.b32.xlu1 %v2789_v34, %s2547_s30 }
  0x74   : > { %621 = vrot.lane.b32.xlu0 %v234_v35, %s2547_s30 }
  0x75   : > { %v2797_v36 = vpop.permute.xlu2 %499 }
  0x76   : > { %4471 = vst [vmem:[#allocation5_spill] sm:$0xff] %v2797_v36  ;;  %v2945_v36 = vld [vmem:[%s2627_s28 + $0x12a] sm:$0xff] }
  0x7b   : > { %631 = vrot.lane.b32.xlu2 %v2800_v37, %s2547_s30  ;;  %629 = vrot.lane.b32.xlu1 %v2803_v38, %s2547_s30 }
  0x7c   : > { %627 = vrot.lane.b32.xlu0 %v2806_v39, %s2547_s30 }
  0x7d   : > { %v2814_v40 = vpop.permute.xlu2 %501 }
  0x7e   : > { %4472 = vst [vmem:[#allocation6_spill] sm:$0xff] %v2814_v40  ;;  %v2924_v40 = vld [vmem:[%s2627_s28 + $0x10a] sm:$0xff] }
  0x83   : > { %637 = vrot.lane.b32.xlu2 %v2817_v41, %s2547_s30  ;;  %635 = vrot.lane.b32.xlu1 %v2820_v42, %s2547_s30 }
  0x84   : > { %633 = vrot.lane.b32.xlu0 %v2823_v43, %s2547_s30 }
  0x85   : > { %v2831_v44 = vpop.permute.xlu2 %507 }
  0x86   : > { %4473 = vst [vmem:[#allocation7_spill] sm:$0xff] %v2831_v44  ;;  %v2921_v44 = vld [vmem:[%s2627_s28 + $0x112] sm:$0xff] }
  0x8b   : > { %643 = vrot.lane.b32.xlu2 %v2834_v45, %s2547_s30  ;;  %641 = vrot.lane.b32.xlu1 %v2837_v46, %s2547_s30 }
  0x8c   : > { %639 = vrot.lane.b32.xlu0 %v2840_v47, %s2547_s30 }
  0x8d   : > { %v2848_v48 = vpop.permute.xlu2 %513  ;;  %v2850_v49 = vpop.permute.xlu1 %495 }
  0x8e   : > { %4474 = vst [vmem:[#allocation8_spill] sm:$0xff] %v2848_v48  ;;  %v2852_v50 = vpop.permute.xlu0 %491  ;;  %v2918_v48 = vld [vmem:[%s2627_s28 + $0x122] sm:$0xff] }
  0x8f   : > { %4475 = vst [vmem:[#allocation9_spill] sm:$0xff] %v2850_v49  ;;  %v2981_v49 = vld [vmem:[%s2627_s28 + $0x172] sm:$0xff] }
  0x90   : > { %4476 = vst [vmem:[#allocation10_spill] sm:$0xff] %v2852_v50  ;;  %v2939_v50 = vld [vmem:[%s2627_s28 + $0x142] sm:$0xff] }
  0x91   : > { %4489 = vst [vmem:[#allocation23_spill] sm:$0xff] %v2939_v50 }
  0x92   : > { %4499 = vst [vmem:[#allocation33_spill] sm:$0xff] %v2981_v49 }
  0x93   : > { %649 = vrot.lane.b32.xlu2 %v2855_v51, %s2547_s30  ;;  %647 = vrot.lane.b32.xlu1 %v2858_v52, %s2547_s30 }
  0x94   : > { %645 = vrot.lane.b32.xlu0 %v2861_v53, %s2547_s30 }
  0x95   : > { %v2869_v54 = vpop.permute.xlu2 %519  ;;  %v2871_v55 = vpop.permute.xlu1 %497 }
  0x96   : > { %4477 = vst [vmem:[#allocation11_spill] sm:$0xff] %v2869_v54  ;;  %v2873_v56 = vpop.permute.xlu0 %493 }
  0x97   : > { %4478 = vst [vmem:[#allocation12_spill] sm:$0xff] %v2871_v55  ;;  %v2984_v55 = vld [vmem:[%s2627_s28 + $0x18] sm:$0xff] }
  0x98   : > { %4479 = vst [vmem:[#allocation13_spill] sm:$0xff] %v2873_v56  ;;  %v2960_v56 = vld [vmem:[%s2627_s28 + $0x16a] sm:$0xff] }
  0x99   : > { %4493 = vst [vmem:[#allocation27_spill] sm:$0xff] %v2960_v56 }
  0x9a   : > { %4500 = vst [vmem:[#allocation34_spill] sm:$0xff] %v2984_v55 }
  0x9b   : > { %655 = vrot.lane.b32.xlu2 %v2876_v57, %s2547_s30  ;;  %653 = vrot.lane.b32.xlu1 %v2879_v58, %s2547_s30 }
  0x9c   : > { %651 = vrot.lane.b32.xlu0 %v2882_v59, %s2547_s30 }
  0x9d   : > { %v2890_v60 = vpop.permute.xlu2 %525  ;;  %v2892_v61 = vpop.permute.xlu1 %505 }
  0x9e   : > { %4480 = vst [vmem:[#allocation14_spill] sm:$0xff] %v2890_v60  ;;  %v2894_v62 = vpop.permute.xlu0 %503  ;;  %v2966_v60 = vld [vmem:[%s2627_s28 + $0x152] sm:$0xff] }
  0x9f   : > { %4481 = vst [vmem:[#allocation15_spill] sm:$0xff] %v2892_v61  ;;  %v2942_v61 = vld [vmem:[%s2627_s28 + $0x13a] sm:$0xff] }
  0xa0   : > { %4482 = vst [vmem:[#allocation16_spill] sm:$0xff] %v2894_v62 }
  0xa1   : > { %4495 = vst [vmem:[#allocation29_spill] sm:$0xff] %v2966_v60 }
  0xa3   : > { %661 = vrot.lane.b32.xlu2 %v2897_v63, %s2547_s30  ;;  %659 = vrot.lane.b32.xlu1 %v2900_v2, %s2547_s30 }
  0xa4   : > { %657 = vrot.lane.b32.xlu0 %v2903_v5, %s2547_s30 }
  0xa5   : > { %v2911_v30 = vpop.permute.xlu2 %531  ;;  %v2913_v35 = vpop.permute.xlu1 %511 }
  0xa6   : > { %4483 = vst [vmem:[#allocation17_spill] sm:$0xff] %v2911_v30  ;;  %v2915_v54 = vpop.permute.xlu0 %509  ;;  %v2963_v30 = vld [vmem:[%s2627_s28 + $0x15a] sm:$0xff] }
  0xa7   : > { %4484 = vst [vmem:[#allocation18_spill] sm:$0xff] %v2913_v35 }
  0xa8   : > { %4485 = vst [vmem:[#allocation19_spill] sm:$0xff] %v2915_v54 }
  0xa9   : > { %4494 = vst [vmem:[#allocation28_spill] sm:$0xff] %v2963_v30 }
  0xab   : > { %667 = vrot.lane.b32.xlu2 %v2918_v48, %s2547_s30  ;;  %665 = vrot.lane.b32.xlu1 %v2921_v44, %s2547_s30 }
  0xac   : > { %663 = vrot.lane.b32.xlu0 %v2924_v40, %s2547_s30 }
  0xad   : > { %v2932_v62 = vpop.permute.xlu2 %537  ;;  %v2934_v54 = vpop.permute.xlu1 %517 }
  0xae   : > { %4486 = vst [vmem:[#allocation20_spill] sm:$0xff] %v2932_v62  ;;  %v2936_v35 = vpop.permute.xlu0 %515 }
  0xaf   : > { %4487 = vst [vmem:[#allocation21_spill] sm:$0xff] %v2934_v54 }
  0xb0   : > { %4488 = vst [vmem:[#allocation22_spill] sm:$0xff] %v2936_v35 }
  0xb3   : > { %673 = vrot.lane.b32.xlu2 %v2939_v50, %s2547_s30  ;;  %671 = vrot.lane.b32.xlu1 %v2942_v61, %s2547_s30  ;;  %v3002_v50 = vld [vmem:[%s2627_s28 + $0x38] sm:$0xff] }
  0xb4   : > { %669 = vrot.lane.b32.xlu0 %v2945_v36, %s2547_s30  ;;  %4505 = vst [vmem:[#allocation39_spill] sm:$0xff] %v3002_v50 }
  0xb5   : > { %v2953_v54 = vpop.permute.xlu2 %543  ;;  %v2955_v35 = vpop.permute.xlu1 %523 }
  0xb6   : > { %4490 = vst [vmem:[#allocation24_spill] sm:$0xff] %v2953_v54  ;;  %v2957_v62 = vpop.permute.xlu0 %521 }
  0xb7   : > { %4491 = vst [vmem:[#allocation25_spill] sm:$0xff] %v2955_v35 }
  0xb8   : > { %4492 = vst [vmem:[#allocation26_spill] sm:$0xff] %v2957_v62 }
  0xbb   : > { %679 = vrot.lane.b32.xlu2 %v2960_v56, %s2547_s30  ;;  %677 = vrot.lane.b32.xlu1 %v2963_v30, %s2547_s30  ;;  %v2987_v56 = vld [vmem:[%s2627_s28 + $0x20] sm:$0xff]  ;;  %v3008_v30 = vld [vmem:[%s2627_s28 + $0x30] sm:$0xff] }
  0xbc   : > { %675 = vrot.lane.b32.xlu0 %v2966_v60, %s2547_s30  ;;  %4501 = vst [vmem:[#allocation35_spill] sm:$0xff] %v2987_v56  ;;  %v3005_v60 = vld [vmem:[%s2627_s28 + $0x48] sm:$0xff] }
  0xbd   : > { %v2974_v54 = vpop.permute.xlu2 %549  ;;  %v2976_v35 = vpop.permute.xlu1 %529  ;;  %4506 = vst [vmem:[#allocation40_spill] sm:$0xff] %v3005_v60 }
  0xbe   : > { %4496 = vst [vmem:[#allocation30_spill] sm:$0xff] %v2974_v54  ;;  %v2978_v62 = vpop.permute.xlu0 %527 }
  0xbf   : > { %4497 = vst [vmem:[#allocation31_spill] sm:$0xff] %v2976_v35 }
  0xc0   : > { %4498 = vst [vmem:[#allocation32_spill] sm:$0xff] %v2978_v62 }
  0xc1   : > { %4507 = vst [vmem:[#allocation41_spill] sm:$0xff] %v3008_v30 }
  0xc3   : > { %749 = vrot.lane.b32.xlu2 %v2987_v56, %s2548_s4  ;;  %747 = vrot.lane.b32.xlu1 %v2984_v55, %s2548_s4  ;;  %v3023_v55 = vld [vmem:[%s2627_s28 + $0x60] sm:$0xff]  ;;  %v3026_v56 = vld [vmem:[%s2627_s28 + $0x68] sm:$0xff] }
  0xc4   : > { %681 = vrot.lane.b32.xlu0 %v2981_v49, %s2547_s30  ;;  %4511 = vst [vmem:[#allocation45_spill] sm:$0xff] %v3023_v55  ;;  %v3029_v49 = vld [vmem:[%s2627_s28 + $0x50] sm:$0xff] }
  0xc5   : > { %v2995_v54 = vpop.permute.xlu2 %619  ;;  %v2997_v35 = vpop.permute.xlu1 %535  ;;  %4512 = vst [vmem:[#allocation46_spill] sm:$0xff] %v3026_v56 }
  0xc6   : > { %4502 = vst [vmem:[#allocation36_spill] sm:$0xff] %v2995_v54  ;;  %v2999_v62 = vpop.permute.xlu0 %533 }
  0xc7   : > { %4503 = vst [vmem:[#allocation37_spill] sm:$0xff] %v2997_v35 }
  0xc8   : > { %4504 = vst [vmem:[#allocation38_spill] sm:$0xff] %v2999_v62 }
  0xc9   : > { %4513 = vst [vmem:[#allocation47_spill] sm:$0xff] %v3029_v49 }
  0xcb   : > { %755 = vrot.lane.b32.xlu2 %v3005_v60, %s2548_s4  ;;  %753 = vrot.lane.b32.xlu1 %v3002_v50, %s2548_s4  ;;  %v3045_v60 = vld [vmem:[%s2627_s28 + $0x90] sm:$0xff] }
  0xcc   : > { %751 = vrot.lane.b32.xlu0 %v3008_v30, %s2548_s4  ;;  %4517 = vst [vmem:[#allocation51_spill] sm:$0xff] %v3045_v60 }
  0xcd   : > { %v3016_v54 = vpop.permute.xlu2 %625  ;;  %v3018_v35 = vpop.permute.xlu1 %541 }
  0xce   : > { %4508 = vst [vmem:[#allocation42_spill] sm:$0xff] %v3016_v54  ;;  %v3020_v62 = vpop.permute.xlu0 %539  ;;  %v3048_v54 = vld [vmem:[%s2627_s28 + $0x78] sm:$0xff] }
  0xcf   : > { %4509 = vst [vmem:[#allocation43_spill] sm:$0xff] %v3018_v35 }
  0xd0   : > { %4510 = vst [vmem:[#allocation44_spill] sm:$0xff] %v3020_v62  ;;  %v180_v62 = vld [vmem:[%s2627_s28 + $0x80] sm:$0xff] }
  0xd1   : > { %4518 = vst [vmem:[#allocation52_spill] sm:$0xff] %v3048_v54 }
  0xd3   : > { %761 = vrot.lane.b32.xlu2 %v3026_v56, %s2548_s4  ;;  %759 = vrot.lane.b32.xlu1 %v3023_v55, %s2548_s4  ;;  %v3063_v56 = vld [vmem:[%s2627_s28 + $0xb0] sm:$0xff] }
  0xd4   : > { %757 = vrot.lane.b32.xlu0 %v3029_v49, %s2548_s4  ;;  %4522 = vst [vmem:[#allocation56_spill] sm:$0xff] %v3063_v56  ;;  %v3066_v49 = vld [vmem:[%s2627_s28 + $0x98] sm:$0xff] }
  0xd5   : > { %v3037_v50 = vpop.permute.xlu2 %631  ;;  %v3039_v35 = vpop.permute.xlu1 %547  ;;  %4523 = vst [vmem:[#allocation57_spill] sm:$0xff] %v3066_v49 }
  0xd6   : > { %4514 = vst [vmem:[#allocation48_spill] sm:$0xff] %v3037_v50  ;;  %v3041_v30 = vpop.permute.xlu0 %545 }
  0xd7   : > { %4515 = vst [vmem:[#allocation49_spill] sm:$0xff] %v3039_v35 }
  0xd8   : > { %4516 = vst [vmem:[#allocation50_spill] sm:$0xff] %v3041_v30  ;;  %v183_v30 = vld [vmem:[%s2627_s28 + $0xa8] sm:$0xff] }
  0xdb   : > { %767 = vrot.lane.b32.xlu2 %v3045_v60, %s2548_s4  ;;  %765 = vrot.lane.b32.xlu1 %v180_v62, %s2548_s4  ;;  %v3083_v60 = vld [vmem:[%s2627_s28 + $0xd8] sm:$0xff] }
  0xdc   : > { %763 = vrot.lane.b32.xlu0 %v3048_v54, %s2548_s4  ;;  %4528 = vst [vmem:[#allocation62_spill] sm:$0xff] %v3083_v60  ;;  %v3086_v54 = vld [vmem:[%s2627_s28 + $0xc0] sm:$0xff] }
  0xdd   : > { %v3055_v55 = vpop.permute.xlu2 %637  ;;  %v3057_v50 = vpop.permute.xlu1 %553  ;;  %4529 = vst [vmem:[#allocation63_spill] sm:$0xff] %v3086_v54 }
  0xde   : > { %4519 = vst [vmem:[#allocation53_spill] sm:$0xff] %v3055_v55  ;;  %v3059_v35 = vpop.permute.xlu0 %551 }
  0xdf   : > { %4520 = vst [vmem:[#allocation54_spill] sm:$0xff] %v3057_v50 }
  0xe0   : > { %4521 = vst [vmem:[#allocation55_spill] sm:$0xff] %v3059_v35  ;;  %v3080_v35 = vld [vmem:[%s2627_s28 + $0xc8] sm:$0xff] }
  0xe1   : > { %4527 = vst [vmem:[#allocation61_spill] sm:$0xff] %v3080_v35 }
  0xe3   : > { %773 = vrot.lane.b32.xlu2 %v3063_v56, %s2548_s4  ;;  %771 = vrot.lane.b32.xlu1 %v183_v30, %s2548_s4  ;;  %v3101_v56 = vld [vmem:[%s2627_s28 + $0xf0] sm:$0xff] }
  0xe4   : > { %769 = vrot.lane.b32.xlu0 %v3066_v49, %s2548_s4  ;;  %4533 = vst [vmem:[#allocation67_spill] sm:$0xff] %v3101_v56  ;;  %v3107_v49 = vld [vmem:[%s2627_s28 + $0xe0] sm:$0xff] }
  0xe5   : > { %v3073_v62 = vpop.permute.xlu2 %643  ;;  %v3075_v55 = vpop.permute.xlu1 %623  ;;  %4535 = vst [vmem:[#allocation69_spill] sm:$0xff] %v3107_v49 }
  0xe6   : > { %4524 = vst [vmem:[#allocation58_spill] sm:$0xff] %v3073_v62  ;;  %v3077_v50 = vpop.permute.xlu0 %621 }
  0xe7   : > { %4525 = vst [vmem:[#allocation59_spill] sm:$0xff] %v3075_v55  ;;  %v3104_v55 = vld [vmem:[%s2627_s28 + $0xf8] sm:$0xff] }
  0xe8   : > { %4526 = vst [vmem:[#allocation60_spill] sm:$0xff] %v3077_v50 }
  0xe9   : > { %4534 = vst [vmem:[#allocation68_spill] sm:$0xff] %v3104_v55 }
  0xeb   : > { %779 = vrot.lane.b32.xlu2 %v3083_v60, %s2548_s4  ;;  %777 = vrot.lane.b32.xlu1 %v3080_v35, %s2548_s4  ;;  %v3122_v60 = vld [vmem:[%s2627_s28 + $0x110] sm:$0xff] }
  0xec   : > { %775 = vrot.lane.b32.xlu0 %v3086_v54, %s2548_s4  ;;  %4539 = vst [vmem:[#allocation73_spill] sm:$0xff] %v3122_v60  ;;  %v3128_v54 = vld [vmem:[%s2627_s28 + $0x108] sm:$0xff] }
  0xed   : > { %v3094_v30 = vpop.permute.xlu2 %649  ;;  %v3096_v62 = vpop.permute.xlu1 %629  ;;  %4541 = vst [vmem:[#allocation75_spill] sm:$0xff] %v3128_v54 }
  0xee   : > { %4530 = vst [vmem:[#allocation64_spill] sm:$0xff] %v3094_v30  ;;  %v3098_v50 = vpop.permute.xlu0 %627  ;;  %v3125_v30 = vld [vmem:[%s2627_s28 + $0x120] sm:$0xff] }
  0xef   : > { %4531 = vst [vmem:[#allocation65_spill] sm:$0xff] %v3096_v62 }
  0xf0   : > { %4532 = vst [vmem:[#allocation66_spill] sm:$0xff] %v3098_v50 }
  0xf1   : > { %4540 = vst [vmem:[#allocation74_spill] sm:$0xff] %v3125_v30 }
  0xf3   : > { %785 = vrot.lane.b32.xlu2 %v3104_v55, %s2548_s4  ;;  %783 = vrot.lane.b32.xlu1 %v3101_v56, %s2548_s4  ;;  %v3143_v55 = vld [vmem:[%s2627_s28 + $0x138] sm:$0xff] }
  0xf4   : > { %781 = vrot.lane.b32.xlu0 %v3107_v49, %s2548_s4  ;;  %4545 = vst [vmem:[#allocation79_spill] sm:$0xff] %v3143_v55  ;;  %v3149_v49 = vld [vmem:[%s2627_s28 + $0x128] sm:$0xff] }
  0xf5   : > { %v3115_v62 = vpop.permute.xlu2 %655  ;;  %v3117_v50 = vpop.permute.xlu1 %635  ;;  %4547 = vst [vmem:[#allocation81_spill] sm:$0xff] %v3149_v49 }
  0xf6   : > { %4536 = vst [vmem:[#allocation70_spill] sm:$0xff] %v3115_v62  ;;  %v3119_v35 = vpop.permute.xlu0 %633  ;;  %v3146_v62 = vld [vmem:[%s2627_s28 + $0x140] sm:$0xff] }
  0xf7   : > { %4537 = vst [vmem:[#allocation71_spill] sm:$0xff] %v3117_v50 }
  0xf8   : > { %4538 = vst [vmem:[#allocation72_spill] sm:$0xff] %v3119_v35 }
  0xf9   : > { %4546 = vst [vmem:[#allocation80_spill] sm:$0xff] %v3146_v62 }
  0xfb   : > { %791 = vrot.lane.b32.xlu2 %v3125_v30, %s2548_s4  ;;  %789 = vrot.lane.b32.xlu1 %v3122_v60, %s2548_s4  ;;  %v3170_v60 = vld [vmem:[%s2627_s28 + $0x150] sm:$0xff] }
  0xfc   : > { %787 = vrot.lane.b32.xlu0 %v3128_v54, %s2548_s4  ;;  %v3167_v54 = vld [vmem:[%s2627_s28 + $0x168] sm:$0xff] }
  0xfd   : > { %v3136_v50 = vpop.permute.xlu2 %661  ;;  %v3138_v35 = vpop.permute.xlu1 %641  ;;  %4551 = vst [vmem:[#allocation85_spill] sm:$0xff] %v3167_v54 }
  0xfe   : > { %4542 = vst [vmem:[#allocation76_spill] sm:$0xff] %v3136_v50  ;;  %v3140_v56 = vpop.permute.xlu0 %639  ;;  %v3164_v50 = vld [vmem:[%s2627_s28 + $0x158] sm:$0xff] }
  0xff   : > { %4543 = vst [vmem:[#allocation77_spill] sm:$0xff] %v3138_v35 }
 0x100   : > { %4544 = vst [vmem:[#allocation78_spill] sm:$0xff] %v3140_v56 }
 0x103   : > { %797 = vrot.lane.b32.xlu2 %v3146_v62, %s2548_s4  ;;  %795 = vrot.lane.b32.xlu1 %v3143_v55, %s2548_s4  ;;  %v3191_v55 = vld [vmem:[%s2627_s28 + $0x170] sm:$0xff] }
 0x104   : > { %793 = vrot.lane.b32.xlu0 %v3149_v49, %s2548_s4  ;;  %v3188_v49 = vld [vmem:[%s2627_s28 + $0x180] sm:$0xff]  ;;  %4556 = vst [vmem:[#allocation90_spill] sm:$0xff] %v3191_v55 }
 0x105   : > { %v3157_v35 = vpop.permute.xlu2 %667  ;;  %v3159_v56 = vpop.permute.xlu1 %647  ;;  %4555 = vst [vmem:[#allocation89_spill] sm:$0xff] %v3188_v49 }
 0x106   : > { %4548 = vst [vmem:[#allocation82_spill] sm:$0xff] %v3157_v35  ;;  %v3161_v30 = vpop.permute.xlu0 %645  ;;  %v3185_v35 = vld [vmem:[%s2627_s28 + $0x188] sm:$0xff] }
 0x107   : > { %4549 = vst [vmem:[#allocation83_spill] sm:$0xff] %v3159_v56 }
 0x108   : > { %4550 = vst [vmem:[#allocation84_spill] sm:$0xff] %v3161_v30 }
 0x109   : > { %4554 = vst [vmem:[#allocation88_spill] sm:$0xff] %v3185_v35 }
 0x10b   : > { %803 = vrot.lane.b32.xlu2 %v3167_v54, %s2548_s4  ;;  %801 = vrot.lane.b32.xlu1 %v3164_v50, %s2548_s4 }
 0x10c   : > { %799 = vrot.lane.b32.xlu0 %v3170_v60, %s2548_s4 }
 0x10d   : > { %v3178_v62 = vpop.permute.xlu2 %673  ;;  %v3180_v56 = vpop.permute.xlu1 %653 }
 0x10e   : > { %4552 = vst [vmem:[#allocation86_spill] sm:$0xff] %v3180_v56  ;;  %v3182_v30 = vpop.permute.xlu0 %651 }
 0x10f   : > { %4553 = vst [vmem:[#allocation87_spill] sm:$0xff] %v3182_v30 }
 0x113   : > { %809 = vrot.lane.b32.xlu2 %v3185_v35, %s2548_s4  ;;  %807 = vrot.lane.b32.xlu1 %v3188_v49, %s2548_s4 }
 0x114   : > { %805 = vrot.lane.b32.xlu0 %v3191_v55, %s2548_s4  ;;  %s161_s4 = sand.u32 1, %s2536_s13  }
 0x115   : > { %v3199_v54 = vpop.permute.xlu2 %679  ;;  %v3201_v56 = vpop.permute.xlu1 %659  ;;  %s2101_s19 = scalar_lea.sflag [#allocation3], %s161_s4 }
 0x116   : > { %v3203_v30 = vpop.permute.xlu0 %657 }
 0x11b   : > { %879 = vrot.lane.b32.xlu2 %v2630_v0, %s2549_s5  ;;  %877 = vrot.lane.b32.xlu1 %v2645_v4, %s2549_s5 }
 0x11c   : > { %875 = vrot.lane.b32.xlu0 %v2633_v1, %s2549_s5 }
 0x11d   : > { %v3211_v35 = vpop.permute.xlu2 %749  ;;  %v3213_v49 = vpop.permute.xlu1 %665 }
 0x11e   : > { %v3215_v55 = vpop.permute.xlu0 %663 }
 0x123   : > { %885 = vrot.lane.b32.xlu2 %v2657_v7, %s2549_s5  ;;  %883 = vrot.lane.b32.xlu1 %v2660_v8, %s2549_s5 }
 0x124   : > { %881 = vrot.lane.b32.xlu0 %v2642_v3, %s2549_s5 }
 0x125   : > { %v3223_v0 = vpop.permute.xlu2 %755  ;;  %v3225_v4 = vpop.permute.xlu1 %671 }
 0x126   : > { %v3227_v1 = vpop.permute.xlu0 %669 }
 0x12b   : > { %891 = vrot.lane.b32.xlu2 %v2672_v10, %s2549_s5  ;;  %889 = vrot.lane.b32.xlu1 %v2675_v11, %s2549_s5 }
 0x12c   : > { %887 = vrot.lane.b32.xlu0 %v2654_v6, %s2549_s5 }
 0x12d   : > { %v3235_v7 = vpop.permute.xlu2 %761  ;;  %v3237_v8 = vpop.permute.xlu1 %677 }
 0x12e   : > { %v3239_v3 = vpop.permute.xlu0 %675 }
 0x133   : > { %897 = vrot.lane.b32.xlu2 %v2687_v13, %s2549_s5  ;;  %895 = vrot.lane.b32.xlu1 %v2690_v14, %s2549_s5 }
 0x134   : > { %893 = vrot.lane.b32.xlu0 %v2669_v9, %s2549_s5 }
 0x135   : > { %v3247_v10 = vpop.permute.xlu2 %767  ;;  %v3249_v11 = vpop.permute.xlu1 %747 }
 0x136   : > { %4557 = vst [vmem:[#allocation91_spill] sm:$0xff] %v3247_v10  ;;  %v3251_v6 = vpop.permute.xlu0 %681  ;;  %v4604_v10 = vld [vmem:[#allocation59_spill] sm:$0xff] }
 0x137   : > { %4558 = vst [vmem:[#allocation92_spill] sm:$0xff] %v3249_v11 }
 0x138   : > { %4559 = vst [vmem:[#allocation93_spill] sm:$0xff] %v3251_v6  ;;  %v4603_v6 = vld [vmem:[#allocation34_spill] sm:$0xff] }
 0x13b   : > { %903 = vrot.lane.b32.xlu2 %v2702_v16, %s2549_s5  ;;  %901 = vrot.lane.b32.xlu1 %v2705_v17, %s2549_s5 }
 0x13c   : > { %899 = vrot.lane.b32.xlu0 %v2684_v12, %s2549_s5 }
 0x13d   : > { %v3259_v13 = vpop.permute.xlu2 %773  ;;  %v3261_v14 = vpop.permute.xlu1 %753 }
 0x13e   : > { %4560 = vst [vmem:[#allocation94_spill] sm:$0xff] %v3259_v13  ;;  %v3263_v9 = vpop.permute.xlu0 %751 }
 0x143   : > { %909 = vrot.lane.b32.xlu2 %v2717_v19, %s2549_s5  ;;  %907 = vrot.lane.b32.xlu1 %v2720_v20, %s2549_s5 }
 0x144   : > { %905 = vrot.lane.b32.xlu0 %v2699_v15, %s2549_s5 }
 0x145   : > { %v3271_v16 = vpop.permute.xlu2 %779  ;;  %v3273_v17 = vpop.permute.xlu1 %759 }
 0x146   : > { %4561 = vst [vmem:[#allocation95_spill] sm:$0xff] %v3273_v17  ;;  %v3275_v12 = vpop.permute.xlu0 %757  ;;  %v4589_v17 = vld [vmem:[#allocation35_spill] sm:$0xff] }
 0x147   : > { %4562 = vst [vmem:[#allocation96_spill] sm:$0xff] %v3275_v12  ;;  %v4588_v12 = vld [vmem:[#allocation12_spill] sm:$0xff] }
 0x14b   : > { %915 = vrot.lane.b32.xlu2 %v2732_v22, %s2549_s5  ;;  %913 = vrot.lane.b32.xlu1 %v2735_v23, %s2549_s5 }
 0x14c   : > { %911 = vrot.lane.b32.xlu0 %v2714_v18, %s2549_s5 }
 0x14d   : > { %v3283_v19 = vpop.permute.xlu2 %785  ;;  %v3285_v20 = vpop.permute.xlu1 %765 }
 0x14e   : > { %4563 = vst [vmem:[#allocation97_spill] sm:$0xff] %v3285_v20  ;;  %v3287_v15 = vpop.permute.xlu0 %763  ;;  %v2278_v20 = vld [vmem:[%s2627_s28 + $0x30] sm:$0xff] }
 0x14f   : > { %4564 = vst [vmem:[#allocation98_spill] sm:$0xff] %v3287_v15  ;;  %v2279_v15 = vld [vmem:[%s2627_s28 + $0x38] sm:$0xff] }
 0x153   : > { %921 = vrot.lane.b32.xlu2 %v2747_v25, %s2549_s5  ;;  %919 = vrot.lane.b32.xlu1 %v2750_v26, %s2549_s5 }
 0x154   : > { %917 = vrot.lane.b32.xlu0 %v2729_v21, %s2549_s5 }
 0x155   : > { %v3295_v22 = vpop.permute.xlu2 %791  ;;  %v3297_v18 = vpop.permute.xlu1 %771 }
 0x156   : > { %4565 = vst [vmem:[#allocation99_spill] sm:$0xff] %v3297_v18  ;;  %v3299_v23 = vpop.permute.xlu0 %769  ;;  %v2244_v18 = vld [vmem:[%s2627_s28 + $0x181] sm:$0xff] }
 0x157   : > { %4566 = vst [vmem:[#allocation100_spill] sm:$0xff] %v3299_v23  ;;  %v2245_v23 = vld [vmem:[%s2627_s28 + $0x189] sm:$0xff] }
 0x15b   : > { %927 = vrot.lane.b32.xlu2 %v2762_v28, %s2549_s5  ;;  %925 = vrot.lane.b32.xlu1 %v2765_v29, %s2549_s5 }
 0x15c   : > { %923 = vrot.lane.b32.xlu0 %v2744_v24, %s2549_s5 }
 0x15d   : > { %v3307_v25 = vpop.permute.xlu2 %797  ;;  %v3309_v21 = vpop.permute.xlu1 %777 }
 0x15e   : > { %v3311_v26 = vpop.permute.xlu0 %775 }
 0x15f   : > { %4567 = vst [vmem:[#allocation101_spill] sm:$0xff] %v3311_v26 }
 0x163   : > { %933 = vrot.lane.b32.xlu2 %v2775_v31, %s2549_s5  ;;  %931 = vrot.lane.b32.xlu1 %v2778_v32, %s2549_s5 }
 0x164   : > { %929 = vrot.lane.b32.xlu0 %v2759_v27, %s2549_s5 }
 0x165   : > { %v3319_v28 = vpop.permute.xlu2 %803  ;;  %v3321_v29 = vpop.permute.xlu1 %783 }
 0x166   : > { %v3323_v24 = vpop.permute.xlu0 %781 }
 0x16b   : > { %1003 = vrot.lane.b32.xlu2 %v2789_v34, %s2550_s6  ;;  %937 = vrot.lane.b32.xlu1 %v2245_v23, %s2549_s5 }
 0x16c   : > { %935 = vrot.lane.b32.xlu0 %v2244_v18, %s2549_s5  ;;  %s2180_s5 = sshll.u32 %s161_s4, 4 }
 0x16d   : > { %v3331_v31 = vpop.permute.xlu2 %809  ;;  %v3333_v32 = vpop.permute.xlu1 %789  ;;  %s163_s10 = scalar_lea.vmem [#allocation2], %s2180_s5 }
 0x16e   : > { %4568 = vst [vmem:[#allocation102_spill] sm:$0xff] %v3331_v31  ;;  %v3335_v27 = vpop.permute.xlu0 %787  ;;  %s2114_s11 = sshll.u32 %s163_s10, 4  ;;  %s2115_s11 = int_to_ptr.vmem [resolvable:$true] %s2114_s11 }
 0x173   : > { %1009 = vrot.lane.b32.xlu2 %v2803_v38, %s2550_s6  ;;  %1007 = vrot.lane.b32.xlu1 %v2806_v39, %s2550_s6 }
 0x174   : > { %1005 = vrot.lane.b32.xlu0 %v2786_v33, %s2550_s6 }
 0x175   : > { %v3343_v34 = vpop.permute.xlu2 %879  ;;  %v3345_v23 = vpop.permute.xlu1 %795 }
 0x176   : > { %v3347_v18 = vpop.permute.xlu0 %793 }
 0x17b   : > { %1015 = vrot.lane.b32.xlu2 %v2820_v42, %s2550_s6  ;;  %1013 = vrot.lane.b32.xlu1 %v2823_v43, %s2550_s6 }
 0x17c   : > { %1011 = vrot.lane.b32.xlu0 %v2800_v37, %s2550_s6 }
 0x17d   : > { %v3355_v38 = vpop.permute.xlu2 %885  ;;  %v3357_v39 = vpop.permute.xlu1 %801 }
 0x17e   : > { %4569 = vst [vmem:[#allocation103_spill] sm:$0xff] %v3355_v38  ;;  %v3359_v33 = vpop.permute.xlu0 %799  ;;  %v3461_v38 = vld [vmem:[%s2627_s28 + $0x18a] sm:$0xff] }
 0x183   : > { %1021 = vrot.lane.b32.xlu2 %v2837_v46, %s2550_s6  ;;  %1019 = vrot.lane.b32.xlu1 %v2840_v47, %s2550_s6 }
 0x184   : > { %1017 = vrot.lane.b32.xlu0 %v2817_v41, %s2550_s6 }
 0x185   : > { %v3367_v42 = vpop.permute.xlu2 %891  ;;  %v3369_v43 = vpop.permute.xlu1 %807 }
 0x186   : > { %4570 = vst [vmem:[#allocation104_spill] sm:$0xff] %v3367_v42  ;;  %v3371_v37 = vpop.permute.xlu0 %805  ;;  %v3444_v42 = vld [vmem:[%s2627_s28 + $0x182] sm:$0xff] }
 0x18b   : > { %1027 = vrot.lane.b32.xlu2 %v2858_v52, %s2550_s6  ;;  %1025 = vrot.lane.b32.xlu1 %v2861_v53, %s2550_s6 }
 0x18c   : > { %1023 = vrot.lane.b32.xlu0 %v2834_v45, %s2550_s6 }
 0x18d   : > { %v3379_v46 = vpop.permute.xlu2 %897  ;;  %v3381_v47 = vpop.permute.xlu1 %877 }
 0x18e   : > { %4571 = vst [vmem:[#allocation105_spill] sm:$0xff] %v3379_v46  ;;  %v3383_v41 = vpop.permute.xlu0 %875 }
 0x18f   : > { %4572 = vst [vmem:[#allocation106_spill] sm:$0xff] %v3383_v41  ;;  %v4602_v41 = vld [vmem:[#allocation9_spill] sm:$0xff] }
 0x190   : > { %v1486_v11 = vsel %vm1483_vm0, %v4603_v6, %v4602_v41 }
 0x193   : > { %1033 = vrot.lane.b32.xlu2 %v2879_v58, %s2550_s6  ;;  %1031 = vrot.lane.b32.xlu1 %v2882_v59, %s2550_s6 }
 0x194   : > { %1029 = vrot.lane.b32.xlu0 %v2855_v51, %s2550_s6 }
 0x195   : > { %v3391_v52 = vpop.permute.xlu2 %903  ;;  %v3393_v53 = vpop.permute.xlu1 %883 }
 0x196   : > { %4573 = vst [vmem:[#allocation107_spill] sm:$0xff] %v3391_v52  ;;  %v882_v45 = vpop.permute.xlu0 %881 }
 0x19b   : > { %1039 = vrot.lane.b32.xlu2 %v2900_v2, %s2550_s6  ;;  %1037 = vrot.lane.b32.xlu1 %v2903_v5, %s2550_s6  ;;  %v4579_v5 = vld [vmem:[#allocation28_spill] sm:$0xff] }
 0x19c   : > { %1035 = vrot.lane.b32.xlu0 %v2876_v57, %s2550_s6  ;;  %4582 = vst [vmem:[#allocation28_spill] sm:$0xff] %v3444_v42 }
 0x19d   : > { %v3401_v58 = vpop.permute.xlu2 %909  ;;  %v3403_v59 = vpop.permute.xlu1 %889 }
 0x19e   : > { %v3405_v26 = vpop.permute.xlu0 %887 }
 0x19f   : > { %4574 = vst [vmem:[#allocation108_spill] sm:$0xff] %v3405_v26  ;;  %v2282_v26 = vld [vmem:[%s2627_s28 + $0x60] sm:$0xff] }
 0x1a3   : > { %1045 = vrot.lane.b32.xlu2 %v2921_v44, %s2550_s6  ;;  %1043 = vrot.lane.b32.xlu1 %v2924_v40, %s2550_s6 }
 0x1a4   : > { %1041 = vrot.lane.b32.xlu0 %v2897_v63, %s2550_s6 }
 0x1a5   : > { %v3413_v51 = vpop.permute.xlu2 %915  ;;  %v3415_v2 = vpop.permute.xlu1 %895 }
 0x1a6   : > { %4575 = vst [vmem:[#allocation109_spill] sm:$0xff] %v3415_v2  ;;  %v3417_v57 = vpop.permute.xlu0 %893 }
 0x1a7   : > { %4576 = vst [vmem:[#allocation110_spill] sm:$0xff] %v3417_v57 }
 0x1ab   : > { %1051 = vrot.lane.b32.xlu2 %v2942_v61, %s2550_s6  ;;  %1049 = vrot.lane.b32.xlu1 %v2945_v36, %s2550_s6  ;;  %v4580_v61 = vld [vmem:[#allocation29_spill] sm:$0xff]  ;;  %v4581_v36 = vld [vmem:[#allocation23_spill] sm:$0xff] }
 0x1ac   : > { %1047 = vrot.lane.b32.xlu0 %v2918_v48, %s2550_s6  ;;  %4586 = vst [vmem:[#allocation23_spill] sm:$0xff] %v3461_v38 }
 0x1ad   : > { %v3425_v40 = vpop.permute.xlu2 %921  ;;  %v3427_v44 = vpop.permute.xlu1 %901 }
 0x1ae   : > { %4577 = vst [vmem:[#allocation111_spill] sm:$0xff] %v3427_v44  ;;  %v3429_v63 = vpop.permute.xlu0 %899  ;;  %v1487_v44 = vsel %vm1483_vm0, %v4589_v17, %v4588_v12 }
 0x1af   : > { %4578 = vst [vmem:[#allocation112_spill] sm:$0xff] %v3429_v63  ;;  %v4583_v63 = vld [vmem:[#allocation33_spill] sm:$0xff] }
 0x1b3   : > { %1057 = vrot.lane.b32.xlu2 %v4579_v5, %s2550_s6  ;;  %1055 = vrot.lane.b32.xlu1 %v4580_v61, %s2550_s6  ;;  %v4584_v5 = vld [vmem:[#allocation27_spill] sm:$0xff] }
 0x1b4   : > { %1053 = vrot.lane.b32.xlu0 %v4581_v36, %s2550_s6 }
 0x1b5   : > { %v3437_v52 = vpop.permute.xlu2 %927  ;;  %v3439_v48 = vpop.permute.xlu1 %907 }
 0x1b6   : > { %v3441_v46 = vpop.permute.xlu0 %905 }
 0x1bb   : > { %1063 = vrot.lane.b32.xlu2 %v3444_v42, %s2550_s6  ;;  %1061 = vrot.lane.b32.xlu1 %v4583_v63, %s2550_s6 }
 0x1bc   : > { %1059 = vrot.lane.b32.xlu0 %v4584_v5, %s2550_s6 }
 0x1bd   : > { %v3452_v61 = vpop.permute.xlu2 %933  ;;  %v3454_v36 = vpop.permute.xlu1 %913 }
 0x1be   : > { %4585 = vst [vmem:[#allocation29_spill] sm:$0xff] %v3452_v61  ;;  %v3456_v57 = vpop.permute.xlu0 %911  ;;  %v4624_v61 = vld [vmem:[#allocation76_spill] sm:$0xff] }
 0x1c3   : > { %1133 = vrot.lane.b32.xlu2 %v2279_v15, %s2551_s7  ;;  %1131 = vrot.lane.b32.xlu1 %v2278_v20, %s2551_s7  ;;  %v4590_v15 = vld [vmem:[#allocation42_spill] sm:$0xff] }
 0x1c4   : > { %1065 = vrot.lane.b32.xlu0 %v3461_v38, %s2550_s6  ;;  %v1520_v20 = vsel %vm1516_vm1, %v1487_v44, %v4590_v15  ;;  %v4591_v38 = vld [vmem:[#allocation47_spill] sm:$0xff]  ;;  %v2285_v15 = vld [vmem:[%s2627_s28 + $0x80] sm:$0xff]  ;;  %s2412_s6 = sshll.u32 %s2595_s16, 4 }
 0x1c5   : > { %v3467_v63 = vpop.permute.xlu2 %1003  ;;  %v3469_v5 = vpop.permute.xlu1 %919  ;;  %v1553_v13 = vsel %vm1549_vm2, %v1520_v20, %v3261_v14  ;;  %v4594_v14 = vld [vmem:[#allocation52_spill] sm:$0xff]  ;;  %v4595_v20 = vld [vmem:[#allocation46_spill] sm:$0xff] }
 0x1c6   : > { %4587 = vst [vmem:[#allocation33_spill] sm:$0xff] %v3467_v63  ;;  %v3471_v42 = vpop.permute.xlu0 %917  ;;  %v4592_v63 = vld [vmem:[#allocation40_spill] sm:$0xff]  ;;  %v1586_v17 = vsel %vm1582_vm3, %v1553_v13, %v882_v45 }
 0x1cb   : > { %1139 = vrot.lane.b32.xlu2 %v2282_v26, %s2551_s7  ;;  %1137 = vrot.lane.b32.xlu1 %v4591_v38, %s2551_s7 }
 0x1cc   : > { %1135 = vrot.lane.b32.xlu0 %v4592_v63, %s2551_s7 }
 0x1cd   : > { %v1010_v12 = vpop.permute.xlu2 %1009  ;;  %v3487_v31 = vpop.permute.xlu1 %925 }
 0x1ce   : > { %v3490_v44 = vsel %vm1615_vm4, %v1586_v17, %v1010_v12  ;;  %v3492_v26 = vpop.permute.xlu0 %923  ;;  %v2288_v17 = vld [vmem:[%s2627_s28 + $0xa8] sm:$0xff]  ;;  %v4598_v12 = vld [vmem:[#allocation57_spill] sm:$0xff] }
 0x1cf   : > { %4593 = vst [vmem:[#allocation27_spill] sm:$0xff] %v3490_v44 }
 0x1d3   : > { %1145 = vrot.lane.b32.xlu2 %v2285_v15, %s2551_s7  ;;  %1143 = vrot.lane.b32.xlu1 %v4594_v14, %s2551_s7  ;;  %v4599_v15 = vld [vmem:[#allocation51_spill] sm:$0xff] }
 0x1d4   : > { %1141 = vrot.lane.b32.xlu0 %v4595_v20, %s2551_s7 }
 0x1d5   : > { %v3500_v13 = vpop.permute.xlu2 %1015  ;;  %v3502_v45 = vpop.permute.xlu1 %931 }
 0x1d6   : > { %4596 = vst [vmem:[#allocation12_spill] sm:$0xff] %v3500_v13  ;;  %v3504_v63 = vpop.permute.xlu0 %929  ;;  %v2291_v13 = vld [vmem:[%s2627_s28 + $0xc8] sm:$0xff] }
 0x1d7   : > { %4597 = vst [vmem:[#allocation35_spill] sm:$0xff] %v3502_v45 }
 0x1db   : > { %1151 = vrot.lane.b32.xlu2 %v2288_v17, %s2551_s7  ;;  %1149 = vrot.lane.b32.xlu1 %v4598_v12, %s2551_s7  ;;  %v1519_v17 = vsel %vm1516_vm1, %v1486_v11, %v4604_v10  ;;  %v4605_v12 = vld [vmem:[#allocation63_spill] sm:$0xff] }
 0x1dc   : > { %1147 = vrot.lane.b32.xlu0 %v4599_v15, %s2551_s7  ;;  %v1552_v15 = vsel %vm1549_vm2, %v1519_v17, %v3263_v9  ;;  %v2294_v11 = vld [vmem:[%s2627_s28 + $0xf0] sm:$0xff]  ;;  %v4610_v9 = vld [vmem:[#allocation64_spill] sm:$0xff] }
 0x1dd   : > { %v3512_v44 = vpop.permute.xlu2 %1021  ;;  %v3514_v2 = vpop.permute.xlu1 %937 }
 0x1de   : > { %4600 = vst [vmem:[#allocation42_spill] sm:$0xff] %v3512_v44  ;;  %v3516_v20 = vpop.permute.xlu0 %935  ;;  %v4606_v44 = vld [vmem:[#allocation56_spill] sm:$0xff] }
 0x1df   : > { %4601 = vst [vmem:[#allocation47_spill] sm:$0xff] %v3514_v2  ;;  %v1585_v2 = vsel %vm1582_vm3, %v1552_v15, %v3343_v34  ;;  %v4611_v34 = vld [vmem:[#allocation69_spill] sm:$0xff] }
 0x1e3   : > { %1157 = vrot.lane.b32.xlu2 %v2291_v13, %s2551_s7  ;;  %1155 = vrot.lane.b32.xlu1 %v4605_v12, %s2551_s7  ;;  %v4609_v13 = vld [vmem:[#allocation26_spill] sm:$0xff] }
 0x1e4   : > { %1153 = vrot.lane.b32.xlu0 %v4606_v44, %s2551_s7  ;;  %v1499_v45 = vsel %vm1483_vm0, %v4606_v44, %v4609_v13 }
 0x1e5   : > { %v3533_v14 = vpop.permute.xlu2 %1027  ;;  %v1008_v6 = vpop.permute.xlu1 %1007  ;;  %v1532_v17 = vsel %vm1516_vm1, %v1499_v45, %v4610_v9  ;;  %v4616_v9 = vld [vmem:[#allocation70_spill] sm:$0xff] }
 0x1e6   : > { %4607 = vst [vmem:[#allocation51_spill] sm:$0xff] %v3533_v14  ;;  %v3536_v41 = vsel %vm1615_vm4, %v1585_v2, %v1008_v6  ;;  %v3538_v10 = vpop.permute.xlu0 %1005  ;;  %v1565_v15 = vsel %vm1549_vm2, %v1532_v17, %v3309_v21  ;;  %v4612_v2 = vld [vmem:[#allocation62_spill] sm:$0xff]  ;;  %v4617_v17 = vld [vmem:[#allocation73_spill] sm:$0xff] }
 0x1e7   : > { %4608 = vst [vmem:[#allocation9_spill] sm:$0xff] %v3536_v41  ;;  %v1598_v6 = vsel %vm1582_vm3, %v1565_v15, %v3441_v46  ;;  %v4618_v46 = vld [vmem:[#allocation75_spill] sm:$0xff] }
 0x1eb   : > { %1163 = vrot.lane.b32.xlu2 %v2294_v11, %s2551_s7  ;;  %1161 = vrot.lane.b32.xlu1 %v4611_v34, %s2551_s7  ;;  %v4615_v11 = vld [vmem:[#allocation32_spill] sm:$0xff] }
 0x1ec   : > { %1159 = vrot.lane.b32.xlu0 %v4612_v2, %s2551_s7  ;;  %v1502_v13 = vsel %vm1483_vm0, %v4612_v2, %v4615_v11 }
 0x1ed   : > { %v1034_v14 = vpop.permute.xlu2 %1033  ;;  %v3555_v41 = vpop.permute.xlu1 %1013  ;;  %v1535_v21 = vsel %vm1516_vm1, %v1502_v13, %v4616_v9  ;;  %v4623_v9 = vld [vmem:[#allocation38_spill] sm:$0xff] }
 0x1ee   : > { %4613 = vst [vmem:[#allocation34_spill] sm:$0xff] %v3555_v41  ;;  %v3558_v44 = vsel %vm1615_vm4, %v1598_v6, %v1034_v14  ;;  %v3560_v45 = vpop.permute.xlu0 %1011  ;;  %v1568_v15 = vsel %vm1549_vm2, %v1535_v21, %v3321_v29  ;;  %v4619_v14 = vld [vmem:[#allocation68_spill] sm:$0xff]  ;;  %v4625_v21 = vld [vmem:[#allocation79_spill] sm:$0xff] }
 0x1ef   : > { %4614 = vst [vmem:[#allocation59_spill] sm:$0xff] %v3558_v44  ;;  %v1601_v6 = vsel %vm1582_vm3, %v1568_v15, %v3456_v57  ;;  %v1505_v41 = vsel %vm1483_vm0, %v4619_v14, %v4623_v9  ;;  %v4626_v57 = vld [vmem:[#allocation81_spill] sm:$0xff]  ;;  %v4630_v9 = vld [vmem:[#allocation44_spill] sm:$0xff] }
 0x1f0   : > { %v1538_v29 = vsel %vm1516_vm1, %v1505_v41, %v4624_v61 }
 0x1f1   : > { %v1571_v15 = vsel %vm1549_vm2, %v1538_v29, %v3333_v32 }
 0x1f3   : > { %1169 = vrot.lane.b32.xlu2 %v4617_v17, %s2551_s7  ;;  %1167 = vrot.lane.b32.xlu1 %v4618_v46, %s2551_s7 }
 0x1f4   : > { %1165 = vrot.lane.b32.xlu0 %v4619_v14, %s2551_s7 }
 0x1f5   : > { %v1040_v44 = vpop.permute.xlu2 %1039  ;;  %v3577_v2 = vpop.permute.xlu1 %1019 }
 0x1f6   : > { %4620 = vst [vmem:[#allocation63_spill] sm:$0xff] %v3577_v2  ;;  %v3580_v11 = vsel %vm1615_vm4, %v1601_v6, %v1040_v44  ;;  %v3582_v13 = vpop.permute.xlu0 %1017  ;;  %v4627_v44 = vld [vmem:[#allocation74_spill] sm:$0xff]  ;;  %v1604_v6 = vsel %vm1582_vm3, %v1571_v15, %v3471_v42 }
 0x1f7   : > { %4621 = vst [vmem:[#allocation56_spill] sm:$0xff] %v3580_v11  ;;  %v1508_v2 = vsel %vm1483_vm0, %v4627_v44, %v4630_v9  ;;  %v4636_v9 = vld [vmem:[#allocation61_spill] sm:$0xff] }
 0x1f8   : > { %4622 = vst [vmem:[#allocation26_spill] sm:$0xff] %v3582_v13  ;;  %v4631_v13 = vld [vmem:[#allocation82_spill] sm:$0xff] }
 0x1f9   : > { %v1541_v32 = vsel %vm1516_vm1, %v1508_v2, %v4631_v13 }
 0x1fa   : > { %v1574_v42 = vsel %vm1549_vm2, %v1541_v32, %v3345_v23  ;;  %v4638_v32 = vld [vmem:[#allocation25_spill] sm:$0xff] }
 0x1fb   : > { %1175 = vrot.lane.b32.xlu2 %v4625_v21, %s2551_s7  ;;  %1173 = vrot.lane.b32.xlu1 %v4626_v57, %s2551_s7  ;;  %v1607_v29 = vsel %vm1582_vm3, %v1574_v42, %v3492_v26  ;;  %v1500_v26 = vsel %vm1483_vm0, %v4605_v12, %v4638_v32 }
 0x1fc   : > { %1171 = vrot.lane.b32.xlu0 %v4627_v44, %s2551_s7 }
 0x1fd   : > { %v1046_v11 = vpop.permute.xlu2 %1045  ;;  %v3599_v14 = vpop.permute.xlu1 %1025 }
 0x1fe   : > { %4628 = vst [vmem:[#allocation64_spill] sm:$0xff] %v3599_v14  ;;  %v3602_v61 = vsel %vm1615_vm4, %v1604_v6, %v1046_v11  ;;  %v3604_v41 = vpop.permute.xlu0 %1023  ;;  %v4632_v11 = vld [vmem:[#allocation80_spill] sm:$0xff]  ;;  %v4635_v6 = vld [vmem:[#allocation14_spill] sm:$0xff] }
 0x1ff   : > { %4629 = vst [vmem:[#allocation69_spill] sm:$0xff] %v3602_v61  ;;  %v1501_v61 = vsel %vm1483_vm0, %v4636_v9, %v4635_v6  ;;  %v4637_v14 = vld [vmem:[#allocation50_spill] sm:$0xff]  ;;  %v4642_v6 = vld [vmem:[#allocation87_spill] sm:$0xff] }
 0x200   : > { %v1511_v23 = vsel %vm1483_vm0, %v4632_v11, %v4637_v14  ;;  %v1533_v14 = vsel %vm1516_vm1, %v1500_v26, %v4642_v6  ;;  %v4645_v6 = vld [vmem:[#allocation67_spill] sm:$0xff] }
 0x201   : > { %v1544_v42 = vsel %vm1516_vm1, %v1511_v23, %v3178_v62 }
 0x202   : > { %v1577_v62 = vsel %vm1549_vm2, %v1544_v42, %v3357_v39 }
 0x203   : > { %1181 = vrot.lane.b32.xlu2 %v3164_v50, %s2551_s7  ;;  %1179 = vrot.lane.b32.xlu1 %v3170_v60, %s2551_s7  ;;  %v1610_v9 = vsel %vm1582_vm3, %v1577_v62, %v3504_v63 }
 0x204   : > { %1177 = vrot.lane.b32.xlu0 %v4632_v11, %s2551_s7  ;;  %v4643_v11 = vld [vmem:[#allocation85_spill] sm:$0xff] }
 0x205   : > { %v1052_v15 = vpop.permute.xlu2 %1051  ;;  %v3621_v44 = vpop.permute.xlu1 %1031 }
 0x206   : > { %4633 = vst [vmem:[#allocation62_spill] sm:$0xff] %v3621_v44  ;;  %v3624_v2 = vsel %vm1615_vm4, %v1607_v29, %v1052_v15  ;;  %v3626_v13 = vpop.permute.xlu0 %1029  ;;  %v4639_v44 = vld [vmem:[#allocation86_spill] sm:$0xff]  ;;  %v4640_v15 = vld [vmem:[#allocation89_spill] sm:$0xff] }
 0x207   : > { %4634 = vst [vmem:[#allocation32_spill] sm:$0xff] %v3624_v2  ;;  %v1534_v29 = vsel %vm1516_vm1, %v1501_v61, %v4639_v44  ;;  %v4641_v2 = vld [vmem:[#allocation90_spill] sm:$0xff]  ;;  %v1566_v61 = vsel %vm1549_vm2, %v1533_v14, %v3271_v16  ;;  %v4646_v14 = vld [vmem:[#allocation55_spill] sm:$0xff] }
 0x208   : > { %v1567_v12 = vsel %vm1549_vm2, %v1534_v29, %v3323_v24  ;;  %v1599_v24 = vsel %vm1582_vm3, %v1566_v61, %v3439_v48  ;;  %v2309_v29 = vld [vmem:[%s2627_s28 + $0x1a0] sm:$0xff]  ;;  %v1514_v48 = vsel %vm1483_vm0, %v4643_v11, %v4646_v14  ;;  %v4650_v14 = vld [vmem:[#allocation20_spill] sm:$0xff] }
 0x209   : > { %v1600_v44 = vsel %vm1582_vm3, %v1567_v12, %v3401_v58  ;;  %v2308_v58 = vld [vmem:[%s2627_s28 + $0x198] sm:$0xff]  ;;  %v4647_v12 = vld [vmem:[#allocation31_spill] sm:$0xff]  ;;  %v1547_v61 = vsel %vm1516_vm1, %v1514_v48, %v3199_v54 }
 0x20a   : > { %v1503_v62 = vsel %vm1483_vm0, %v4611_v34, %v4647_v12  ;;  %v1580_v34 = vsel %vm1549_vm2, %v1547_v61, %v3369_v43  ;;  %v4648_v54 = vld [vmem:[#allocation88_spill] sm:$0xff] }
 0x20b   : > { %1187 = vrot.lane.b32.xlu2 %v4640_v15, %s2551_s7  ;;  %1185 = vrot.lane.b32.xlu1 %v4641_v2, %s2551_s7  ;;  %v4644_v15 = vld [vmem:[#allocation17_spill] sm:$0xff]  ;;  %v4651_v48 = vld [vmem:[#allocation60_spill] sm:$0xff] }
 0x20c   : > { %1183 = vrot.lane.b32.xlu0 %v4643_v11, %s2551_s7  ;;  %v1504_v63 = vsel %vm1483_vm0, %v4645_v6, %v4644_v15  ;;  %v2311_v15 = vld [vmem:[%s2627_s28 + $0x39] sm:$0xff] }
 0x20d   : > { %v1058_v23 = vpop.permute.xlu2 %1057  ;;  %v1038_v32 = vpop.permute.xlu1 %1037  ;;  %v4649_v6 = vld [vmem:[#allocation13_spill] sm:$0xff] }
 0x20e   : > { %v3662_v26 = vsel %vm1615_vm4, %v1610_v9, %v1058_v23  ;;  %v3665_v39 = vsel %vm1615_vm4, %v1600_v44, %v1038_v32  ;;  %v1036_v42 = vpop.permute.xlu0 %1035  ;;  %v1537_v44 = vsel %vm1516_vm1, %v1504_v63, %v3201_v56  ;;  %v1536_v9 = vsel %vm1516_vm1, %v1503_v62, %v3203_v30  ;;  %v2310_v63 = vld [vmem:[%s2627_s28 + $0x31] sm:$0xff]  ;;  %v4652_v62 = vld [vmem:[#allocation37_spill] sm:$0xff] }
 0x20f   : > { %v3668_v16 = vsel %vm1615_vm4, %v1599_v24, %v1036_v42  ;;  %v1570_v11 = vsel %vm1549_vm2, %v1537_v44, %v3335_v27  ;;  %v1569_v56 = vsel %vm1549_vm2, %v1536_v9, %v3283_v19  ;;  %v1613_v30 = vsel %vm1582_vm3, %v1580_v34, %v3516_v20  ;;  %v170_v42 = vld [vmem:[%s2627_s28 + $0x8] sm:$0xff] }
 0x210   : > { %v1603_v23 = vsel %vm1582_vm3, %v1570_v11, %v3413_v51  ;;  %v1602_v27 = vsel %vm1582_vm3, %v1569_v56, %v3454_v36  ;;  %v2312_v51 = vld [vmem:[%s2627_s28 + $0x49] sm:$0xff]  ;;  %v1485_v20 = vsel %vm1483_vm0, %v170_v42, %v4649_v6  ;;  %v1507_v36 = vsel %vm1483_vm0, %v4617_v17, %v4650_v14  ;;  %v2313_v42 = vld [vmem:[%s2627_s28 + $0x51] sm:$0xff] }
 0x211   : > { %v1518_v12 = vsel %vm1516_vm1, %v1485_v20, %v4651_v48  ;;  %v1506_v61 = vsel %vm1483_vm0, %v4618_v46, %v4652_v62  ;;  %v1540_v9 = vsel %vm1516_vm1, %v1507_v36, %v3213_v49 }
 0x212   : > { %v1551_v44 = vsel %vm1549_vm2, %v1518_v12, %v3211_v35  ;;  %v1539_v17 = vsel %vm1516_vm1, %v1506_v61, %v3215_v55  ;;  %v1573_v46 = vsel %vm1549_vm2, %v1540_v9, %v3347_v18  ;;  %v2358_v61 = vld [vmem:[%s2627_s28 + $0xf2] sm:$0xff] }
 0x213   : > { %1193 = vrot.lane.b32.xlu2 %v2309_v29, %s2551_s7  ;;  %1191 = vrot.lane.b32.xlu1 %v2308_v58, %s2551_s7  ;;  %v1584_v35 = vsel %vm1582_vm3, %v1551_v44, %v3381_v47  ;;  %v1572_v49 = vsel %vm1549_vm2, %v1539_v17, %v3295_v22  ;;  %v1606_v11 = vsel %vm1582_vm3, %v1573_v46, %v3425_v40  ;;  %v2314_v40 = vld [vmem:[%s2627_s28 + $0x61] sm:$0xff]  ;;  %v4658_v44 = vld [vmem:[#allocation15_spill] sm:$0xff]  ;;  %v2316_v9 = vld [vmem:[%s2627_s28 + $0x79] sm:$0xff] }
 0x214   : > { %1189 = vrot.lane.b32.xlu0 %v4648_v54, %s2551_s7  ;;  %v1617_v34 = vsel %vm1615_vm4, %v1584_v35, %v3538_v10  ;;  %v1605_v18 = vsel %vm1582_vm3, %v1572_v49, %v3469_v5  ;;  %v4659_v17 = vld [vmem:[#allocation30_spill] sm:$0xff]  ;;  %v4660_v46 = vld [vmem:[#allocation72_spill] sm:$0xff]  ;;  %v4661_v49 = vld [vmem:[#allocation49_spill] sm:$0xff] }
 0x215   : > { %v1064_v32 = vpop.permute.xlu2 %1063  ;;  %v1044_v24 = vpop.permute.xlu1 %1043 }
 0x216   : > { %v3705_v43 = vsel %vm1615_vm4, %v1613_v30, %v1064_v32  ;;  %v3708_v29 = vsel %vm1615_vm4, %v1603_v23, %v1044_v24  ;;  %v1042_v58 = vpop.permute.xlu0 %1041  ;;  %v2315_v30 = vld [vmem:[%s2627_s28 + $0x69] sm:$0xff]  ;;  %v4653_v32 = vld [vmem:[#allocation5_spill] sm:$0xff] }
 0x217   : > { %v3711_v19 = vsel %vm1615_vm4, %v1602_v27, %v1042_v58  ;;  %v4654_v24 = vld [vmem:[#allocation41_spill] sm:$0xff]  ;;  %v4655_v27 = vld [vmem:[#allocation24_spill] sm:$0xff]  ;;  %v4656_v58 = vld [vmem:[#allocation66_spill] sm:$0xff] }
 0x218   : > { %v1488_v10 = vsel %vm1483_vm0, %v4654_v24, %v4653_v32  ;;  %v1510_v5 = vsel %vm1483_vm0, %v4625_v21, %v4655_v27  ;;  %v4664_v32 = vld [vmem:[#allocation35_spill] sm:$0xff] }
 0x219   : > { %v2342_v27 = vld [vmem:[%s2627_s28 + $0x32] sm:$0xff] }
 0x21b   : > { %1263 = vrot.lane.b32.xlu2 %v2312_v51, %s2552_s8  ;;  %1261 = vrot.lane.b32.xlu1 %v2311_v15, %s2552_s8  ;;  %v1521_v51 = vsel %vm1516_vm1, %v1488_v10, %v4656_v58  ;;  %v4657_v15 = vld [vmem:[#allocation43_spill] sm:$0xff] }
 0x21c   : > { %1259 = vrot.lane.b32.xlu0 %v2310_v63, %s2552_s8  ;;  %v1509_v6 = vsel %vm1483_vm0, %v4626_v57, %v4657_v15  ;;  %v1554_v20 = vsel %vm1549_vm2, %v1521_v51, %v3223_v0  ;;  %v1543_v63 = vsel %vm1516_vm1, %v1510_v5, %v3225_v4  ;;  %v4665_v5 = vld [vmem:[#allocation10_spill] sm:$0xff]  ;;  %v4667_v15 = vld [vmem:[#allocation52_spill] sm:$0xff] }
 0x21d   : > { %v1134_v54 = vpop.permute.xlu2 %1133  ;;  %v1050_v55 = vpop.permute.xlu1 %1049  ;;  %v1542_v21 = vsel %vm1516_vm1, %v1509_v6, %v3227_v1  ;;  %v1576_v14 = vsel %vm1549_vm2, %v1543_v63, %v3359_v33  ;;  %v1587_v57 = vsel %vm1582_vm3, %v1554_v20, %v3393_v53  ;;  %v4666_v51 = vld [vmem:[#allocation18_spill] sm:$0xff]  ;;  %v4668_v63 = vld [vmem:[#allocation36_spill] sm:$0xff] }
 0x21e   : > { %v3748_v56 = vsel %vm1648_vm5, %v1617_v34, %v1134_v54  ;;  %v3751_v47 = vsel %vm1615_vm4, %v1606_v11, %v1050_v55  ;;  %v1048_v23 = vpop.permute.xlu0 %1047  ;;  %v1575_v0 = vsel %vm1549_vm2, %v1542_v21, %v3307_v25  ;;  %v1609_v4 = vsel %vm1582_vm3, %v1576_v14, %v3437_v52  ;;  %v2326_v52 = vld [vmem:[%s2627_s28 + $0xf1] sm:$0xff]  ;;  %v2317_v20 = vld [vmem:[%s2627_s28 + $0x81] sm:$0xff] }
 0x21f   : > { %v3754_v22 = vsel %vm1615_vm4, %v1605_v18, %v1048_v23  ;;  %v1620_v36 = vsel %vm1615_vm4, %v1587_v57, %v3560_v45  ;;  %v1608_v33 = vsel %vm1582_vm3, %v1575_v0, %v3487_v31  ;;  %v1491_v45 = vsel %vm1483_vm0, %v4591_v38, %v4658_v44  ;;  %v4663_v18 = vld [vmem:[#allocation26_spill] sm:$0xff] }
 0x220   : > { %v1513_v31 = vsel %vm1483_vm0, %v3164_v50, %v4659_v17  ;;  %v1524_v35 = vsel %vm1516_vm1, %v1491_v45, %v4660_v46  ;;  %v1512_v11 = vsel %vm1483_vm0, %v3170_v60, %v4661_v49  ;;  %v1494_v6 = vsel %vm1483_vm0, %v4667_v15, %v4666_v51  ;;  %v4669_v14 = vld [vmem:[#allocation78_spill] sm:$0xff]  ;;  %v4675_v45 = vld [vmem:[#allocation109_spill] sm:$0xff]  ;;  %v4684_v15 = vld [vmem:[#allocation27_spill] sm:$0xff] }
 0x221   : > { %v1557_v34 = vsel %vm1549_vm2, %v1524_v35, %v3235_v7  ;;  %v1546_v54 = vsel %vm1516_vm1, %v1513_v31, %v3237_v8  ;;  %v1545_v50 = vsel %vm1516_vm1, %v1512_v11, %v3239_v3  ;;  %v4662_v8 = vld [vmem:[#allocation29_spill] sm:$0xff]  ;;  %v1527_v57 = vsel %vm1516_vm1, %v1494_v6, %v4669_v14  ;;  %v4670_v0 = vld [vmem:[#allocation54_spill] sm:$0xff]  ;;  %v2329_v14 = vld [vmem:[%s2627_s28 + $0x111] sm:$0xff] }
 0x222   : > { %v1579_v38 = vsel %vm1549_vm2, %v1546_v54, %v3371_v37  ;;  %v1590_v60 = vsel %vm1582_vm3, %v1557_v34, %v3403_v59  ;;  %v1578_v7 = vsel %vm1549_vm2, %v1545_v50, %v3319_v28  ;;  %v4677_v31 = vld [vmem:[#allocation33_spill] sm:$0xff]  ;;  %v4678_v34 = vld [vmem:[#allocation47_spill] sm:$0xff] }
 0x223   : > { %1269 = vrot.lane.b32.xlu2 %v2315_v30, %s2552_s8  ;;  %1267 = vrot.lane.b32.xlu1 %v2314_v40, %s2552_s8  ;;  %v1612_v55 = vsel %vm1582_vm3, %v1579_v38, %v4662_v8  ;;  %v1623_v23 = vsel %vm1615_vm4, %v1590_v60, %v4663_v18  ;;  %v169_v40 = vld [vmem:[%s2627_s28] sm:$0xff]  ;;  %v1611_v37 = vsel %vm1582_vm3, %v1578_v7, %v4664_v32  ;;  %v2328_v8 = vld [vmem:[%s2627_s28 + $0x109] sm:$0xff] }
 0x224   : > { %1265 = vrot.lane.b32.xlu0 %v2313_v42, %s2552_s8  ;;  %v2327_v42 = vld [vmem:[%s2627_s28 + $0xf9] sm:$0xff]  ;;  %v1484_v58 = vsel %vm1483_vm0, %v169_v40, %v4665_v5  ;;  %v4682_v32 = vld [vmem:[#allocation94_spill] sm:$0xff] }
 0x225   : > { %v1140_v48 = vpop.permute.xlu2 %1139  ;;  %v1056_v1 = vpop.permute.xlu1 %1055  ;;  %v1517_v21 = vsel %vm1516_vm1, %v1484_v58, %v4668_v63  ;;  %v4679_v18 = vld [vmem:[#allocation21_spill] sm:$0xff] }
 0x226   : > { %v3792_v12 = vsel %vm1648_vm5, %v1620_v36, %v1140_v48  ;;  %v3795_v53 = vsel %vm1615_vm4, %v1609_v4, %v1056_v1  ;;  %v1054_v62 = vpop.permute.xlu0 %1053  ;;  %v1515_v4 = vsel %vm1483_vm0, %v4641_v2, %v4670_v0  ;;  %v4671_v36 = vld [vmem:[#allocation91_spill] sm:$0xff]  ;;  %v4672_v1 = vld [vmem:[#allocation92_spill] sm:$0xff]  ;;  %v4685_v63 = vld [vmem:[#allocation9_spill] sm:$0xff] }
 0x227   : > { %v3798_v25 = vsel %vm1615_vm4, %v1608_v33, %v1054_v62  ;;  %v1560_v48 = vsel %vm1549_vm2, %v1527_v57, %v4671_v36  ;;  %v1550_v33 = vsel %vm1549_vm2, %v1517_v21, %v4672_v1  ;;  %v4673_v62 = vld [vmem:[#allocation93_spill] sm:$0xff]  ;;  %v2344_v57 = vld [vmem:[%s2627_s28 + $0x4a] sm:$0xff]  ;;  %v4686_v0 = vld [vmem:[#allocation16_spill] sm:$0xff] }
 0x228   : > { %v1593_v2 = vsel %vm1582_vm3, %v1560_v48, %v4675_v45  ;;  %v2360_v36 = vld [vmem:[%s2627_s28 + $0x10a] sm:$0xff] }
 0x229   : > { %v1626_v35 = vsel %vm1615_vm4, %v1593_v2, %v3604_v41  ;;  %v4688_v48 = vld [vmem:[#allocation6_spill] sm:$0xff]  ;;  %v4689_v1 = vld [vmem:[#allocation39_spill] sm:$0xff] }
 0x22a   : > { %v4692_v45 = vld [vmem:[#allocation95_spill] sm:$0xff] }
 0x22b   : > { %1419 = vrot.lane.b32.xlu2 %v2358_v61, %s2553_s9  ;;  %1291 = vrot.lane.b32.xlu1 %v2326_v52, %s2552_s8  ;;  %v1548_v61 = vsel %vm1516_vm1, %v1515_v4, %v4673_v62  ;;  %v4674_v52 = vld [vmem:[#allocation106_spill] sm:$0xff]  ;;  %v4687_v4 = vld [vmem:[#allocation40_spill] sm:$0xff] }
 0x22c   : > { %1271 = vrot.lane.b32.xlu0 %v2316_v9, %s2552_s8  ;;  %v1583_v44 = vsel %vm1582_vm3, %v1550_v33, %v4674_v52  ;;  %v4676_v9 = vld [vmem:[#allocation102_spill] sm:$0xff]  ;;  %v1489_v33 = vsel %vm1483_vm0, %v4689_v1, %v4688_v48  ;;  %v4690_v62 = vld [vmem:[#allocation48_spill] sm:$0xff]  ;;  %v4691_v52 = vld [vmem:[#allocation65_spill] sm:$0xff] }
 0x22d   : > { %v1146_v3 = vpop.permute.xlu2 %1145  ;;  %v1062_v30 = vpop.permute.xlu1 %1061  ;;  %v1581_v17 = vsel %vm1549_vm2, %v1548_v61, %v4676_v9  ;;  %v1616_v46 = vsel %vm1615_vm4, %v1583_v44, %v4677_v31  ;;  %v1522_v44 = vsel %vm1516_vm1, %v1489_v33, %v4691_v52  ;;  %v4693_v9 = vld [vmem:[#allocation96_spill] sm:$0xff]  ;;  %v4708_v33 = vld [vmem:[#allocation42_spill] sm:$0xff] }
 0x22e   : > { %v3837_v59 = vsel %vm1648_vm5, %v1623_v23, %v1146_v3  ;;  %v3840_v24 = vsel %vm1615_vm4, %v1612_v55, %v1062_v30  ;;  %v1060_v10 = vpop.permute.xlu0 %1059  ;;  %v1614_v54 = vsel %vm1582_vm3, %v1581_v17, %v4678_v34  ;;  %v2343_v55 = vld [vmem:[%s2627_s28 + $0x3a] sm:$0xff]  ;;  %v1555_v17 = vsel %vm1549_vm2, %v1522_v44, %v4693_v9  ;;  %v4709_v44 = vld [vmem:[#allocation63_spill] sm:$0xff] }
 0x22f   : > { %v3843_v28 = vsel %vm1615_vm4, %v1611_v37, %v1060_v10  ;;  %v4680_v23 = vld [vmem:[#allocation57_spill] sm:$0xff]  ;;  %v4681_v30 = vld [vmem:[#allocation84_spill] sm:$0xff]  ;;  %v4683_v10 = vld [vmem:[#allocation111_spill] sm:$0xff] }
 0x230   : > { %v1497_v41 = vsel %vm1483_vm0, %v4680_v23, %v4679_v18  ;;  %v2359_v3 = vld [vmem:[%s2627_s28 + $0xfa] sm:$0xff] }
 0x231   : > { %v1530_v40 = vsel %vm1516_vm1, %v1497_v41, %v4681_v30  ;;  %v4694_v31 = vld [vmem:[#allocation108_spill] sm:$0xff] }
 0x232   : > { %v1563_v37 = vsel %vm1549_vm2, %v1530_v40, %v4682_v32  ;;  %v2366_v30 = vld [vmem:[%s2627_s28 + $0x152] sm:$0xff] }
 0x233   : > { %1293 = vrot.lane.b32.xlu2 %v2327_v42, %s2552_s8  ;;  %1387 = vrot.lane.b32.xlu1 %v2342_v27, %s2553_s9  ;;  %v1596_v42 = vsel %vm1582_vm3, %v1563_v37, %v4683_v10  ;;  %v2361_v40 = vld [vmem:[%s2627_s28 + $0x112] sm:$0xff]  ;;  %v4699_v37 = vld [vmem:[#allocation46_spill] sm:$0xff] }
 0x234   : > { %1273 = vrot.lane.b32.xlu0 %v2317_v20, %s2552_s8  ;;  %v1629_v27 = vsel %vm1615_vm4, %v1596_v42, %v3626_v13  ;;  %v1490_v13 = vsel %vm1483_vm0, %v4687_v4, %v4686_v0  ;;  %v4698_v32 = vld [vmem:[#allocation19_spill] sm:$0xff]  ;;  %v4705_v0 = vld [vmem:[#allocation98_spill] sm:$0xff]  ;;  %v4707_v48 = vld [vmem:[#allocation104_spill] sm:$0xff] }
 0x235   : > { %v1152_v49 = vpop.permute.xlu2 %1151  ;;  %v1132_v11 = vpop.permute.xlu1 %1131  ;;  %v1523_v61 = vsel %vm1516_vm1, %v1490_v13, %v4690_v62  ;;  %v1493_v10 = vsel %vm1483_vm0, %v4699_v37, %v4698_v32  ;;  %v2334_v42 = vld [vmem:[%s2627_s28 + $0x151] sm:$0xff]  ;;  %v4706_v13 = vld [vmem:[#allocation110_spill] sm:$0xff] }
 0x236   : > { %v3882_v50 = vsel %vm1648_vm5, %v1626_v35, %v1152_v49  ;;  %v3885_v38 = vsel %vm1648_vm5, %v1616_v46, %v1132_v11  ;;  %v1066_v60 = vpop.permute.xlu0 %1065  ;;  %v1556_v2 = vsel %vm1549_vm2, %v1523_v61, %v4692_v45  ;;  %v4695_v35 = vld [vmem:[#allocation103_spill] sm:$0xff]  ;;  %v4696_v11 = vld [vmem:[#allocation12_spill] sm:$0xff] }
 0x237   : > { %v3888_v7 = vsel %vm1615_vm4, %v1614_v54, %v1066_v60  ;;  %v1589_v46 = vsel %vm1582_vm3, %v1556_v2, %v4694_v31  ;;  %v1588_v49 = vsel %vm1582_vm3, %v1555_v17, %v4695_v35  ;;  %v2345_v35 = vld [vmem:[%s2627_s28 + $0x52] sm:$0xff] }
 0x238   : > { %v1622_v34 = vsel %vm1615_vm4, %v1589_v46, %v4696_v11  ;;  %v2350_v46 = vld [vmem:[%s2627_s28 + $0x92] sm:$0xff]  ;;  %v4710_v11 = vld [vmem:[#allocation22_spill] sm:$0xff] }
 0x239   : > { %v4714_v32 = vld [vmem:[#allocation99_spill] sm:$0xff] }
 0x23b   : > { %1295 = vrot.lane.b32.xlu2 %v2328_v8, %s2552_s8  ;;  %1389 = vrot.lane.b32.xlu1 %v2343_v55, %s2553_s9  ;;  %v4697_v8 = vld [vmem:[#allocation34_spill] sm:$0xff] }
 0x23c   : > { %1421 = vrot.lane.b32.xlu0 %v2359_v3, %s2553_s9  ;;  %v1621_v55 = vsel %vm1615_vm4, %v1588_v49, %v4697_v8  ;;  %v2477_v49 = vld [vmem:[%s2627_s28 + $0x90] sm:$0xff]  ;;  %v4711_v8 = vld [vmem:[#allocation8_spill] sm:$0xff] }
 0x23d   : > { %v1158_v5 = vpop.permute.xlu2 %1157  ;;  %v1138_v58 = vpop.permute.xlu1 %1137 }
 0x23e   : > { %v3908_v51 = vsel %vm1648_vm5, %v1629_v27, %v1158_v5  ;;  %v3912_v6 = vsel %vm1648_vm5, %v4684_v15, %v1138_v58  ;;  %v1136_v20 = vpop.permute.xlu0 %1135  ;;  %v4700_v27 = vld [vmem:[#allocation7_spill] sm:$0xff]  ;;  %v4701_v5 = vld [vmem:[#allocation45_spill] sm:$0xff] }
 0x23f   : > { %v3916_v21 = vsel %vm1648_vm5, %v4685_v63, %v1136_v20  ;;  %v1492_v58 = vsel %vm1483_vm0, %v4701_v5, %v4700_v27  ;;  %v4703_v20 = vld [vmem:[#allocation71_spill] sm:$0xff]  ;;  %v4716_v27 = vld [vmem:[#allocation112_spill] sm:$0xff] }
 0x240   : > { %v1525_v63 = vsel %vm1516_vm1, %v1492_v58, %v4703_v20  ;;  %v4717_v58 = vld [vmem:[#allocation105_spill] sm:$0xff] }
 0x241   : > { %v1558_v4 = vsel %vm1549_vm2, %v1525_v63, %v4705_v0 }
 0x242   : > { %v1591_v1 = vsel %vm1582_vm3, %v1558_v4, %v4707_v48 }
 0x243   : > { %1297 = vrot.lane.b32.xlu2 %v2329_v14, %s2552_s8  ;;  %1391 = vrot.lane.b32.xlu1 %v2344_v57, %s2553_s9  ;;  %v4704_v14 = vld [vmem:[#allocation97_spill] sm:$0xff]  ;;  %v1624_v45 = vsel %vm1615_vm4, %v1591_v1, %v4709_v44 }
 0x244   : > { %1423 = vrot.lane.b32.xlu0 %v2360_v36, %s2553_s9  ;;  %v2362_v1 = vld [vmem:[%s2627_s28 + $0x122] sm:$0xff] }
 0x245   : > { %v1164_v54 = vpop.permute.xlu2 %1163  ;;  %v1144_v60 = vpop.permute.xlu1 %1143 }
 0x246   : > { %v3948_v18 = vsel %vm1648_vm5, %v3668_v16, %v1164_v54  ;;  %v3951_v23 = vsel %vm1648_vm5, %v1622_v34, %v1144_v60  ;;  %v1142_v41 = vpop.permute.xlu0 %1141  ;;  %v4702_v16 = vld [vmem:[#allocation53_spill] sm:$0xff]  ;;  %v1496_v34 = vsel %vm1483_vm0, %v2477_v49, %v4710_v11  ;;  %v2318_v54 = vld [vmem:[%s2627_s28 + $0x91] sm:$0xff] }
 0x247   : > { %v3954_v3 = vsel %vm1648_vm5, %v1621_v55, %v1142_v41  ;;  %v1526_v15 = vsel %vm1516_vm1, %v1493_v10, %v4702_v16  ;;  %v2478_v60 = vld [vmem:[%s2627_s28 + $0x80] sm:$0xff]  ;;  %v4715_v10 = vld [vmem:[#allocation100_spill] sm:$0xff] }
 0x248   : > { %v1559_v57 = vsel %vm1549_vm2, %v1526_v15, %v4704_v14  ;;  %v1495_v55 = vsel %vm1483_vm0, %v2478_v60, %v4711_v8  ;;  %v4718_v15 = vld [vmem:[#allocation51_spill] sm:$0xff] }
 0x249   : > { %v1592_v36 = vsel %vm1582_vm3, %v1559_v57, %v4706_v13  ;;  %v4719_v57 = vld [vmem:[#allocation64_spill] sm:$0xff] }
 0x24a   : > { %v1625_v62 = vsel %vm1615_vm4, %v1592_v36, %v4708_v33  ;;  %v2335_v33 = vld [vmem:[%s2627_s28 + $0x159] sm:$0xff] }
 0x24b   : > { %1435 = vrot.lane.b32.xlu2 %v2366_v30, %s2553_s9  ;;  %1425 = vrot.lane.b32.xlu1 %v2361_v40, %s2553_s9  ;;  %v4713_v30 = vld [vmem:[#allocation77_spill] sm:$0xff] }
 0x24c   : > { %1307 = vrot.lane.b32.xlu0 %v2334_v42, %s2552_s8  ;;  %v1528_v40 = vsel %vm1516_vm1, %v1495_v55, %v4713_v30  ;;  %v4725_v55 = vld [vmem:[#allocation59_spill] sm:$0xff] }
 0x24d   : > { %v1170_v61 = vpop.permute.xlu2 %1169  ;;  %v1150_v52 = vpop.permute.xlu1 %1149  ;;  %v1561_v42 = vsel %vm1549_vm2, %v1528_v40, %v4715_v10  ;;  %v2346_v40 = vld [vmem:[%s2627_s28 + $0x62] sm:$0xff] }
 0x24e   : > { %v3986_v2 = vsel %vm1648_vm5, %v3711_v19, %v1170_v61  ;;  %v3989_v9 = vsel %vm1648_vm5, %v1625_v62, %v1150_v52  ;;  %v1148_v17 = vpop.permute.xlu0 %1147  ;;  %v4712_v19 = vld [vmem:[#allocation58_spill] sm:$0xff]  ;;  %v1594_v16 = vsel %vm1582_vm3, %v1561_v42, %v4717_v58  ;;  %v4720_v52 = vld [vmem:[#allocation11_spill] sm:$0xff] }
 0x24f   : > { %v3992_v31 = vsel %vm1648_vm5, %v1624_v45, %v1148_v17  ;;  %v1529_v41 = vsel %vm1516_vm1, %v1496_v34, %v4712_v19  ;;  %v1627_v0 = vsel %vm1615_vm4, %v1594_v16, %v4719_v57  ;;  %v2330_v62 = vld [vmem:[%s2627_s28 + $0x121] sm:$0xff]  ;;  %v4721_v45 = vld [vmem:[#allocation83_spill] sm:$0xff] }
 0x250   : > { %v1562_v37 = vsel %vm1549_vm2, %v1529_v41, %v4714_v32  ;;  %v2479_v61 = vld [vmem:[%s2627_s28 + $0xa8] sm:$0xff]  ;;  %v4722_v17 = vld [vmem:[#allocation101_spill] sm:$0xff] }
 0x251   : > { %v1595_v5 = vsel %vm1582_vm3, %v1562_v37, %v4716_v27  ;;  %v1498_v44 = vsel %vm1483_vm0, %v2479_v61, %v4720_v52  ;;  %v2319_v32 = vld [vmem:[%s2627_s28 + $0x99] sm:$0xff]  ;;  %v2363_v61 = vld [vmem:[%s2627_s28 + $0x12a] sm:$0xff] }
 0x252   : > { %v1628_v20 = vsel %vm1615_vm4, %v1595_v5, %v4718_v15  ;;  %v2367_v37 = vld [vmem:[%s2627_s28 + $0x15a] sm:$0xff]  ;;  %v2336_v15 = vld [vmem:[%s2627_s28 + $0x169] sm:$0xff] }
 0x253   : > { %1403 = vrot.lane.b32.xlu2 %v2350_v46, %s2553_s9  ;;  %1393 = vrot.lane.b32.xlu1 %v2345_v35, %s2553_s9  ;;  %v4723_v35 = vld [vmem:[#allocation107_spill] sm:$0xff]  ;;  %v4726_v27 = vld [vmem:[#allocation56_spill] sm:$0xff] }
 0x254   : > { %1275 = vrot.lane.b32.xlu0 %v2318_v54, %s2552_s8  ;;  %v4724_v54 = vld [vmem:[#allocation62_spill] sm:$0xff] }
 0x255   : > { %v1176_v63 = vpop.permute.xlu2 %1175  ;;  %v1156_v14 = vpop.permute.xlu1 %1155 }
 0x256   : > { %v4024_v4 = vsel %vm1648_vm5, %v3754_v22, %v1176_v63  ;;  %v4027_v13 = vsel %vm1648_vm5, %v1628_v20, %v1156_v14  ;;  %v1154_v36 = vpop.permute.xlu0 %1153  ;;  %v1531_v22 = vsel %vm1516_vm1, %v1498_v44, %v4721_v45  ;;  %v2331_v20 = vld [vmem:[%s2627_s28 + $0x129] sm:$0xff]  ;;  %v2351_v63 = vld [vmem:[%s2627_s28 + $0x9a] sm:$0xff] }
 0x257   : > { %v4030_v48 = vsel %vm1648_vm5, %v1627_v0, %v1154_v36  ;;  %v1564_v46 = vsel %vm1549_vm2, %v1531_v22, %v4722_v17  ;;  %v4727_v0 = vld [vmem:[#allocation69_spill] sm:$0xff]  ;;  %v4728_v44 = vld [vmem:[#allocation32_spill] sm:$0xff] }
 0x258   : > { %v1597_v49 = vsel %vm1582_vm3, %v1564_v46, %v4723_v35  ;;  %v1751_v17 = vld [vmem:[%s4413_s1 + $0x20] sm:$0xf]  ;;  %v1750_v46 = vld [vmem:[%s4413_s1 + $0x18] sm:$0xff] }
 0x259   : > { %v1630_v60 = vsel %vm1615_vm4, %v1597_v49, %v4724_v54  ;;  %v2332_v35 = vld [vmem:[%s2627_s28 + $0x139] sm:$0xff]  ;;  %v2352_v49 = vld [vmem:[%s2627_s28 + $0xaa] sm:$0xff]  ;;  %2414 = vmatpush.msk.msra.mxu2 %vm1853_vm6, %v1751_v17  ;;  %2374 = vmatpush.msk.msra.mxu0 %vm1853_vm6, %v1751_v17 }
 0x25a   : > { %2415 = vmatpush.msk.msra.mxu3 %vm1853_vm6, %v1751_v17  ;;  %2413 = vmatpush.msk.msra.mxu1 %vm1853_vm6, %v1751_v17  ;;  %v4729_v17 = vld [vmem:[#allocation28_spill] sm:$0xff] }
 0x25b   : > { %1427 = vrot.lane.b32.xlu2 %v2362_v1, %s2553_s9  ;;  %1309 = vrot.lane.b32.xlu1 %v2335_v33, %s2552_s8  ;;  %v2320_v33 = vld [vmem:[%s2627_s28 + $0xa9] sm:$0xff] }
 0x25c   : > { %1299 = vrot.lane.b32.xlu0 %v2330_v62, %s2552_s8  ;;  %v2368_v62 = vld [vmem:[%s2627_s28 + $0x16a] sm:$0xff]  ;;  %2417 = vmatpush.msra.mxu2 %v1750_v46 }
 0x25d   : > { %v1182_v11 = vpop.permute.xlu2 %1181  ;;  %v1162_v34 = vpop.permute.xlu1 %1161  ;;  %1869 = vmatpush.msra.mxu0 %v1750_v46  ;;  %2418 = vmatpush.msra.mxu3 %v1750_v46 }
 0x25e   : > { %v4051_v8 = vsel %vm1648_vm5, %v3798_v25, %v1182_v11  ;;  %v4055_v19 = vsel %vm1648_vm5, %v4725_v55, %v1162_v34  ;;  %v1160_v41 = vpop.permute.xlu0 %1159  ;;  %v2347_v11 = vld [vmem:[%s2627_s28 + $0x6a] sm:$0xff]  ;;  %2416 = vmatpush.msra.mxu1 %v1750_v46 }
 0x25f   : > { %v4058_v30 = vsel %vm1648_vm5, %v1630_v60, %v1160_v41  ;;  %v1749_v34 = vld [vmem:[%s4413_s1 + $0x10] sm:$0xff] }
 0x260   : > { %2420 = vmatpush.msra.mxu2 %v1749_v34  ;;  %1870 = vmatpush.msra.mxu0 %v1749_v34 }
 0x261   : > { %2421 = vmatpush.msra.mxu3 %v1749_v34  ;;  %2419 = vmatpush.msra.mxu1 %v1749_v34 }
 0x263   : > { %1395 = vrot.lane.b32.xlu2 %v2346_v40, %s2553_s9  ;;  %1277 = vrot.lane.b32.xlu1 %v2319_v32, %s2552_s8 }
 0x264   : > { %1437 = vrot.lane.b32.xlu0 %v2367_v37, %s2553_s9  ;;  %v1747_v37 = vld [vmem:[%s4413_s1] sm:$0xff] }
 0x265   : > { %v1188_v25 = vpop.permute.xlu2 %1187  ;;  %v1168_v10 = vpop.permute.xlu1 %1167 }
 0x266   : > { %v4068_v42 = vsel %vm1648_vm5, %v3843_v28, %v1188_v25  ;;  %v4072_v5 = vsel %vm1648_vm5, %v4726_v27, %v1168_v10  ;;  %v1166_v58 = vpop.permute.xlu0 %1165  ;;  %v2369_v25 = vld [vmem:[%s2627_s28 + $0x172] sm:$0xff] }
 0x267   : > { %v4076_v16 = vsel %vm1648_vm5, %v3665_v39, %v1166_v58 }
 0x26b   : > { %1311 = vrot.lane.b32.xlu2 %v2336_v15, %s2552_s8  ;;  %1301 = vrot.lane.b32.xlu1 %v2331_v20, %s2552_s8  ;;  %v2353_v20 = vld [vmem:[%s2627_s28 + $0xb2] sm:$0xff] }
 0x26c   : > { %1405 = vrot.lane.b32.xlu0 %v2351_v63, %s2553_s9  ;;  %v2348_v63 = vld [vmem:[%s2627_s28 + $0x7a] sm:$0xff] }
 0x26d   : > { %v1194_v28 = vpop.permute.xlu2 %1193  ;;  %v1174_v14 = vpop.permute.xlu1 %1173 }
 0x26e   : > { %v4086_v57 = vsel %vm1648_vm5, %v3888_v7, %v1194_v28  ;;  %v4090_v36 = vsel %vm1648_vm5, %v4727_v0, %v1174_v14  ;;  %v1172_v39 = vpop.permute.xlu0 %1171  ;;  %v2321_v28 = vld [vmem:[%s2627_s28 + $0xb1] sm:$0xff] }
 0x26f   : > { %v4094_v1 = vsel %vm1648_vm5, %v3708_v29, %v1172_v39  ;;  %v2365_v39 = vld [vmem:[%s2627_s28 + $0x142] sm:$0xff] }
 0x273   : > { %1279 = vrot.lane.b32.xlu2 %v2320_v33, %s2552_s8  ;;  %1439 = vrot.lane.b32.xlu1 %v2368_v62, %s2553_s9  ;;  %v2333_v33 = vld [vmem:[%s2627_s28 + $0x141] sm:$0xff] }
 0x274   : > { %1429 = vrot.lane.b32.xlu0 %v2363_v61, %s2553_s9 }
 0x275   : > { %v4102_v7 = vpop.permute.xlu2 %1263  ;;  %v1180_v52 = vpop.permute.xlu1 %1179 }
 0x276   : > { %v4106_v45 = vsel %vm1648_vm5, %v4728_v44, %v1180_v52  ;;  %v1178_v29 = vpop.permute.xlu0 %1177  ;;  %v2349_v44 = vld [vmem:[%s2627_s28 + $0x82] sm:$0xff] }
 0x277   : > { %v4110_v22 = vsel %vm1648_vm5, %v3751_v47, %v1178_v29  ;;  %v1748_v47 = vld [vmem:[%s4413_s1 + $0x8] sm:$0xff] }
 0x278   : > { %2423 = vmatpush.msra.mxu2 %v1748_v47  ;;  %1871 = vmatpush.msra.mxu0 %v1748_v47  ;;  %v2322_v29 = vld [vmem:[%s2627_s28 + $0xc1] sm:$0xff] }
 0x279   : > { %2424 = vmatpush.msra.mxu3 %v1748_v47  ;;  %2422 = vmatpush.msra.mxu1 %v1748_v47 }
 0x27a   : > { %2426 = vmatpush.msra.mxu2 %v1747_v37  ;;  %1872 = vmatpush.msra.mxu0 %v1747_v37 }
 0x27b   : > { %1303 = vrot.lane.b32.xlu2 %v2332_v35, %s2552_s8  ;;  %1407 = vrot.lane.b32.xlu1 %v2352_v49, %s2553_s9 }
 0x27c   : > { %1397 = vrot.lane.b32.xlu0 %v2347_v11, %s2553_s9  ;;  %2427 = vmatpush.msra.mxu3 %v1747_v37 }
 0x27d   : > { %v1270_v54 = vpop.permute.xlu2 %1269  ;;  %v1186_v60 = vpop.permute.xlu1 %1185  ;;  %2425 = vmatpush.msra.mxu1 %v1747_v37 }
 0x27e   : > { %v4132_v55 = vsel %vm1681_vm7, %v3954_v3, %v1270_v54  ;;  %v4136_v41 = vsel %vm1648_vm5, %v3662_v26, %v1186_v60  ;;  %v1184_v40 = vpop.permute.xlu0 %1183  ;;  %v2364_v3 = vld [vmem:[%s2627_s28 + $0x13a] sm:$0xff]  ;;  %v2337_v26 = vld [vmem:[%s2627_s28 + $0x171] sm:$0xff]  ;;  %v2354_v54 = vld [vmem:[%s2627_s28 + $0xc2] sm:$0xff] }
 0x27f   : > { %v4140_v32 = vsel %vm1648_vm5, %v3795_v53, %v1184_v40  ;;  %v4730_v60 = vld [vmem:[#allocation23_spill] sm:$0xff] }
 0x280   : > { %v2481_v40 = vld [vmem:[%s2627_s28 + $0x189] sm:$0xff] }
 0x283   : > { %1441 = vrot.lane.b32.xlu2 %v2369_v25, %s2553_s9  ;;  %1431 = vrot.lane.b32.xlu1 %v2364_v3, %s2553_s9 }
 0x284   : > { %1313 = vrot.lane.b32.xlu0 %v2337_v26, %s2552_s8 }
 0x285   : > { %v1420_v53 = vpop.permute.xlu2 %1419  ;;  %v1192_v10 = vpop.permute.xlu1 %1191 }
 0x286   : > { %v4153_v27 = vsel %vm1648_vm5, %v3705_v43, %v1192_v10  ;;  %v1190_v58 = vpop.permute.xlu0 %1189  ;;  %v2355_v10 = vld [vmem:[%s2627_s28 + $0xca] sm:$0xff] }
 0x287   : > { %v4157_v15 = vsel %vm1648_vm5, %v3840_v24, %v1190_v58  ;;  %v2480_v24 = vld [vmem:[%s2627_s28 + $0x181] sm:$0xff]  ;;  %v2323_v58 = vld [vmem:[%s2627_s28 + $0xc9] sm:$0xff] }
 0x28b   : > { %1409 = vrot.lane.b32.xlu2 %v2353_v20, %s2553_s9  ;;  %1399 = vrot.lane.b32.xlu1 %v2348_v63, %s2553_s9 }
 0x28c   : > { %1281 = vrot.lane.b32.xlu0 %v2321_v28, %s2552_s8 }
 0x28d   : > { %v1294_v14 = vpop.permute.xlu2 %1293  ;;  %v1262_v0 = vpop.permute.xlu1 %1261 }
 0x28e   : > { %v1260_v43 = vpop.permute.xlu0 %1259  ;;  %v1699_v63 = vsel %vm1681_vm7, %v4076_v16, %v1294_v14  ;;  %v1684_v16 = vsel %vm1681_vm7, %v3916_v21, %v4102_v7 }
 0x293   : > { %1433 = vrot.lane.b32.xlu2 %v2365_v39, %s2553_s9  ;;  %1315 = vrot.lane.b32.xlu1 %v2480_v24, %s2552_s8  ;;  %v2324_v24 = vld [vmem:[%s2627_s28 + $0xd9] sm:$0xff] }
 0x294   : > { %1305 = vrot.lane.b32.xlu0 %v2333_v33, %s2552_s8  ;;  %v2356_v33 = vld [vmem:[%s2627_s28 + $0xda] sm:$0xff] }
 0x295   : > { %v1296_v62 = vpop.permute.xlu2 %1295  ;;  %v4171_v61 = vpop.permute.xlu1 %1267 }
 0x296   : > { %v4173_v52 = vpop.permute.xlu0 %1265 }
 0x29b   : > { %1401 = vrot.lane.b32.xlu2 %v2349_v44, %s2553_s9  ;;  %1283 = vrot.lane.b32.xlu1 %v2322_v29, %s2552_s8  ;;  %v1700_v44 = vsel %vm1681_vm7, %v4072_v5, %v1296_v62 }
 0x29c   : > { %1443 = vrot.lane.b32.xlu0 %v4729_v17, %s2553_s9 }
 0x29d   : > { %v1298_v46 = vpop.permute.xlu2 %1297  ;;  %v1292_v35 = vpop.permute.xlu1 %1291 }
 0x29e   : > { %v1698_v49 = vsel %vm1681_vm7, %v3948_v18, %v1292_v35  ;;  %v1272_v11 = vpop.permute.xlu0 %1271  ;;  %v1682_v18 = vsel %vm1681_vm7, %v3885_v38, %v1260_v43  ;;  %v1683_v38 = vsel %vm1681_vm7, %v3748_v56, %v1262_v0  ;;  %v2372_v56 = vld [vmem:[%s2627_s28 + $0x19a] sm:$0xff]  ;;  %v1701_v21 = vsel %vm1681_vm7, %v3986_v2, %v1298_v46 }
 0x29f   : > { %v4185_v34 = vsel %vm1681_vm7, %v3951_v23, %v1272_v11  ;;  %v1731_v47 = vsel %vm1714_vm8, %v1698_v49, %v1420_v53  ;;  %v2340_v53 = vld [vmem:[%s2627_s28 + $0x199] sm:$0xff]  ;;  %v2325_v49 = vld [vmem:[%s2627_s28 + $0xe1] sm:$0xff]  ;;  %v1685_v2 = vsel %vm1681_vm7, %v3912_v6, %v4173_v52 }
 0x2a0   : > { %2391 = vmatmul.msk.f32.vlgmr.msra.gmra.mxu2 %vm1756_vm9, %v1731_v47  ;;  %v2373_v11 = vld [vmem:[%s2627_s28 + $0x1a2] sm:$0xff] }
 0x2a1   : > { %v2341_v47 = vld [vmem:[%s2627_s28 + $0x1a1] sm:$0xff] }
 0x2a3   : > { %1445 = vrot.lane.b32.xlu2 %v4730_v60, %s2553_s9  ;;  %1317 = vrot.lane.b32.xlu1 %v2481_v40, %s2552_s8 }
 0x2a4   : > { %1411 = vrot.lane.b32.xlu0 %v2354_v54, %s2553_s9 }
 0x2a5   : > { %v1436_v23 = vpop.permute.xlu2 %1435  ;;  %v1388_v37 = vpop.permute.xlu1 %1387 }
 0x2a6   : > { %v1274_v25 = vpop.permute.xlu0 %1273  ;;  %v1715_v3 = vsel %vm1714_vm8, %v1682_v18, %v1388_v37  ;;  %v2357_v18 = vld [vmem:[%s2627_s28 + $0xe2] sm:$0xff] }
 0x2a7   : > { %v4200_v26 = vsel %vm1681_vm7, %v3837_v59, %v1274_v25  ;;  %2375 = vmatmul.msk.f32.vlgmr.msra.gmra.mxu0 %vm1756_vm9, %v1715_v3 }
 0x2ab   : > { %1319 = vrot.lane.b32.xlu2 %v2340_v53, %s2552_s8  ;;  %1413 = vrot.lane.b32.xlu1 %v2355_v10, %s2553_s9  ;;  %v1686_v53 = vsel %vm1681_vm7, %v3792_v12, %v4171_v61 }
 0x2ac   : > { %1285 = vrot.lane.b32.xlu0 %v2323_v58, %s2552_s8 }
 0x2ad   : > { %v1404_v20 = vpop.permute.xlu2 %1403  ;;  %v1390_v59 = vpop.permute.xlu1 %1389 }
 0x2ae   : > { %v1422_v28 = vpop.permute.xlu0 %1421  ;;  %v1716_v43 = vsel %vm1714_vm8, %v1683_v38, %v1390_v59 }
 0x2af   : > { %2376 = vmatmul.msk.f32.gmra.mxu0 %vm1756_vm9, %v1716_v43  ;;  %v1732_v39 = vsel %vm1714_vm8, %v1699_v63, %v1422_v28 }
 0x2b0   : > { %2392 = vmatmul.msk.f32.gmra.mxu2 %vm1756_vm9, %v1732_v39 }
 0x2b3   : > { %1415 = vrot.lane.b32.xlu2 %v2356_v33, %s2553_s9  ;;  %1287 = vrot.lane.b32.xlu1 %v2324_v24, %s2552_s8 }
 0x2b4   : > { %1447 = vrot.lane.b32.xlu0 %v2372_v56, %s2553_s9 }
 0x2b5   : > { %v1428_v14 = vpop.permute.xlu2 %1427  ;;  %v1392_v0 = vpop.permute.xlu1 %1391 }
 0x2b6   : > { %v1424_v29 = vpop.permute.xlu0 %1423  ;;  %v1717_v17 = vsel %vm1714_vm8, %v1684_v16, %v1392_v0 }
 0x2b7   : > { %2377 = vmatmul.msk.f32.gmra.mxu0 %vm1756_vm9, %v1717_v17  ;;  %v1733_v35 = vsel %vm1714_vm8, %v1700_v44, %v1424_v29 }
 0x2b8   : > { %2393 = vmatmul.msk.f32.gmra.mxu2 %vm1756_vm9, %v1733_v35 }
 0x2bb   : > { %1289 = vrot.lane.b32.xlu2 %v2325_v49, %s2552_s8  ;;  %1449 = vrot.lane.b32.xlu1 %v2373_v11, %s2553_s9 }
 0x2bc   : > { %1321 = vrot.lane.b32.xlu0 %v2341_v47, %s2552_s8 }
 0x2bd   : > { %v1396_v5 = vpop.permute.xlu2 %1395  ;;  %v1426_v7 = vpop.permute.xlu1 %1425 }
 0x2be   : > { %v1308_v62 = vpop.permute.xlu0 %1307  ;;  %v1734_v54 = vsel %vm1714_vm8, %v1701_v21, %v1426_v7  ;;  %v1719_v52 = vsel %vm1714_vm8, %v1686_v53, %v1396_v5 }
 0x2bf   : > { %v1706_v60 = vsel %vm1681_vm7, %v4106_v45, %v1308_v62 }
 0x2c0   : > { %2394 = vmatmul.msk.f32.gmra.mxu2 %vm1756_vm9, %v1734_v54  ;;  %v1739_v40 = vsel %vm1714_vm8, %v1706_v60, %v1436_v23 }
 0x2c1   : > { %2399 = vmatmul.msk.f32.vlgmr.msra.gmra.mxu3 %vm1756_vm9, %v1739_v40 }
 0x2c4   : > { %1417 = vrot.lane.b32.xlu0 %v2357_v18, %s2553_s9  ;;  %s2112_s9 = scalar_lea.hbm %s4415_s3, %s2412_s6 }
 0x2c5   : > { %v1394_v46 = vpop.permute.xlu1 %1393  ;;  %v1312_v3 = vpop.permute.xlu2 %1311  ;;  %s2116_s17 = sshll.u32 %s2112_s9, 4  ;;  %s2117_s17 = int_to_ptr.hbm [resolvable:$true] %s2116_s17 }
 0x2c6   : > { %v1276_v37 = vpop.permute.xlu0 %1275  ;;  %v1718_v25 = vsel %vm1714_vm8, %v1685_v2, %v1394_v46  ;;  %v1708_v33 = vsel %vm1681_vm7, %v4140_v32, %v1312_v3  ;;  %s2496_s20 = sshra.s32 %s2117_s17, 4  ;;  %s2497_s20 = int_to_ptr.hbm [resolvable:$true] %s2496_s20 }
 0x2c7   : > { %v1690_v45 = vsel %vm1681_vm7, %v3992_v31, %v1276_v37  ;;  %2378 = vmatmul.msk.f32.gmra.mxu0 %vm1756_vm9, %v1718_v25  ;;  %s2498_s24 = scalar_lea.hbm %s2497_s20, 16  ;;  %p2503_p0 = scmp.lt.s32.totalorder %s2497_s20, %s4415_s3 }
 0x2c8   : > { %v1723_v23 = vsel %vm1714_vm8, %v1690_v45, %v1404_v20  ;;  %p2499_p11 = scmp.ne.s32.totalorder %s2497_s20, %s2498_s24  ;;  %p2504_p1 = scmp.lt.s32.totalorder %s2502_s26, %s2498_s24 }
 0x2c9   : > { %2383 = vmatmul.msk.f32.vlgmr.msra.gmra.mxu1 %vm1756_vm9, %v1723_v23 }
 0x2ca   : > { %p2500_p12 = pnand %p2499_p11, %p2612_p5  ;;  %p2505_p2 = por %p2504_p1, %p2503_p0 }
 0x2cc   : > { %p2501_p13 = pneg %p2500_p12 }
 0x2cd   : > { %v1310_v10 = vpop.permute.xlu1 %1309  ;;  %v1280_v38 = vpop.permute.xlu2 %1279 }
 0x2ce   : > { %v1300_v6 = vpop.permute.xlu0 %1299  ;;  %v1707_v59 = vsel %vm1681_vm7, %v4051_v8, %v1310_v10  ;;  %p2506_p3 = pnand %p2505_p2, %p2501_p13 }
 0x2cf   : > { %v1702_v58 = vsel %vm1681_vm7, %v4094_v1, %v1300_v6  ;;  %2379 = vmatmul.msk.f32.gmra.mxu0 %vm1756_vm9, %v1719_v52 }
 0x2d0   : > { %v1735_v31 = vsel %vm1714_vm8, %v1702_v58, %v1428_v14 }
 0x2d1   : > { %2395 = vmatmul.msk.f32.gmra.mxu2 %vm1756_vm9, %v1735_v31 }
 0x2d5   : > { %v1278_v20 = vpop.permute.xlu1 %1277  ;;  %v1304_v61 = vpop.permute.xlu2 %1303 }
 0x2d6   : > { %v1438_v63 = vpop.permute.xlu0 %1437  ;;  %v1691_v1 = vsel %vm1681_vm7, %v3989_v9, %v1278_v20  ;;  %v1692_v9 = vsel %vm1681_vm7, %v3882_v50, %v1280_v38  ;;  %v1704_v35 = vsel %vm1681_vm7, %v4024_v4, %v1304_v61 }
 0x2d7   : > { %v1740_v12 = vsel %vm1714_vm8, %v1707_v59, %v1438_v63 }
 0x2d8   : > { %2400 = vmatmul.msk.f32.gmra.mxu3 %vm1756_vm9, %v1740_v12 }
 0x2dd   : > { %v1302_v28 = vpop.permute.xlu1 %1301  ;;  %v1442_v24 = vpop.permute.xlu2 %1441 }
 0x2de   : > { %v1406_v43 = vpop.permute.xlu0 %1405  ;;  %v1703_v56 = vsel %vm1681_vm7, %v4090_v36, %v1302_v28 }
 0x2df   : > { %v1724_v39 = vsel %vm1714_vm8, %v1691_v1, %v1406_v43 }
 0x2e0   : > { %2384 = vmatmul.msk.f32.gmra.mxu1 %vm1756_vm9, %v1724_v39 }
 0x2e5   : > { %v1440_v8 = vpop.permute.xlu1 %1439  ;;  %v1410_v17 = vpop.permute.xlu2 %1409 }
 0x2e6   : > { %v1430_v16 = vpop.permute.xlu0 %1429  ;;  %v1741_v14 = vsel %vm1714_vm8, %v1708_v33, %v1440_v8 }
 0x2e7   : > { %v1736_v0 = vsel %vm1714_vm8, %v1703_v56, %v1430_v16  ;;  %2401 = vmatmul.msk.f32.gmra.mxu3 %vm1756_vm9, %v1741_v14 }
 0x2e8   : > { %2396 = vmatmul.msk.f32.gmra.mxu2 %vm1756_vm9, %v1736_v0 }
 0x2ed   : > { %v1408_v44 = vpop.permute.xlu1 %1407  ;;  %v1434_v5 = vpop.permute.xlu2 %1433 }
 0x2ee   : > { %v1398_v29 = vpop.permute.xlu0 %1397  ;;  %v1725_v32 = vsel %vm1714_vm8, %v1692_v9, %v1408_v44 }
 0x2ef   : > { %v1720_v36 = vsel %vm1714_vm8, %v4132_v55, %v1398_v29  ;;  %2385 = vmatmul.msk.f32.gmra.mxu1 %vm1756_vm9, %v1725_v32 }
 0x2f0   : > { %2380 = vmatmul.msk.f32.gmra.mxu0 %vm1756_vm9, %v1720_v36 }
 0x2f5   : > { %v1432_v49 = vpop.permute.xlu1 %1431 }
 0x2f6   : > { %v1314_v11 = vpop.permute.xlu0 %1313  ;;  %v1737_v47 = vsel %vm1714_vm8, %v1704_v35, %v1432_v49 }
 0x2f7   : > { %v1709_v50 = vsel %vm1681_vm7, %v4136_v41, %v1314_v11  ;;  %2397 = vmatmul.msk.f32.gmra.mxu2 %vm1756_vm9, %v1737_v47  ;;  %v1402_v41 = vpop.permute.xlu2 %1401 }
 0x2f8   : > { %v1742_v21 = vsel %vm1714_vm8, %v1709_v50, %v1442_v24  ;;  %v1722_v18 = vsel %vm1714_vm8, %v4200_v26, %v1402_v41 }
 0x2f9   : > { %2402 = vmatmul.msk.f32.gmra.mxu3 %vm1756_vm9, %v1742_v21 }
 0x2fd   : > { %v1400_v55 = vpop.permute.xlu1 %1399 }
 0x2fe   : > { %v1282_v7 = vpop.permute.xlu0 %1281  ;;  %v1721_v62 = vsel %vm1714_vm8, %v4185_v34, %v1400_v55 }
 0x2ff   : > { %v1693_v4 = vsel %vm1681_vm7, %v4030_v48, %v1282_v7  ;;  %2381 = vmatmul.msk.f32.gmra.mxu0 %vm1756_vm9, %v1721_v62  ;;  %v1446_v3 = vpop.permute.xlu2 %1445 }
 0x300   : > { %v1726_v54 = vsel %vm1714_vm8, %v1693_v4, %v1410_v17 }
 0x301   : > { %2386 = vmatmul.msk.f32.gmra.mxu1 %vm1756_vm9, %v1726_v54 }
 0x305   : > { %v1316_v60 = vpop.permute.xlu1 %1315 }
 0x306   : > { %v1306_v40 = vpop.permute.xlu0 %1305  ;;  %v1710_v46 = vsel %vm1681_vm7, %v4068_v42, %v1316_v60 }
 0x307   : > { %v1705_v2 = vsel %vm1681_vm7, %v4110_v22, %v1306_v40  ;;  %2382 = vmatmul.msk.f32.gmra.mxu0 %vm1756_vm9, %v1722_v18  ;;  %v1320_v42 = vpop.permute.xlu2 %1319 }
 0x308   : > { %v1738_v34 = vsel %vm1714_vm8, %v1705_v2, %v1434_v5  ;;  %v1712_v12 = vsel %vm1681_vm7, %v4153_v27, %v1320_v42 }
 0x309   : > { %2398 = vmatmul.msk.f32.gmra.mxu2 %vm1756_vm9, %v1738_v34 }
 0x30d   : > { %v1284_v48 = vpop.permute.xlu1 %1283 }
 0x30e   : > { %v1444_v37 = vpop.permute.xlu0 %1443  ;;  %v1694_v22 = vsel %vm1681_vm7, %v4027_v13, %v1284_v48 }
 0x30f   : > { %v1743_v25 = vsel %vm1714_vm8, %v1710_v46, %v1444_v37 }
 0x310   : > { %2403 = vmatmul.msk.f32.gmra.mxu3 %vm1756_vm9, %v1743_v25 }
 0x315   : > { %v1318_v26 = vpop.permute.xlu1 %1317 }
 0x316   : > { %v1711_v45 = vsel %vm1681_vm7, %v4157_v15, %v1318_v26  ;;  %v1412_v23 = vpop.permute.xlu0 %1411  ;;  %v4329_v15 = vld [vmem:[%s4414_s2] ss:$0 sm:$0xff] }
 0x317   : > { %v1727_v53 = vsel %vm1714_vm8, %v1694_v22, %v1412_v23  ;;  %v1744_v10 = vsel %vm1714_vm8, %v1711_v45, %v1446_v3 }
 0x318   : > { %2387 = vmatmul.msk.f32.gmra.mxu1 %vm1756_vm9, %v1727_v53  ;;  %2404 = vmatmul.msk.f32.gmra.mxu3 %vm1756_vm9, %v1744_v10 }
 0x31d   : > { %v1414_v6 = vpop.permute.xlu1 %1413 }
 0x31e   : > { %v1286_v52 = vpop.permute.xlu0 %1285 }
 0x31f   : > { %v1695_v58 = vsel %vm1681_vm7, %v3908_v51, %v1286_v52  ;;  %v1416_v51 = vpop.permute.xlu2 %1415 }
 0x320   : > { %v1728_v13 = vsel %vm1714_vm8, %v1695_v58, %v1414_v6 }
 0x321   : > { %2388 = vmatmul.msk.f32.gmra.mxu1 %vm1756_vm9, %v1728_v13 }
 0x323   : > { %v1922_v31 = vpop.f32.mrf.mxu2 }
 0x324   : > { %v1923_v38 = vadd.f32 %v4329_v15, %v1922_v31  ;;  %v1874_v20 = vpop.f32.mrf.mxu0 }
 0x325   : > { %v1875_v59 = vadd.f32 %v4329_v15, %v1874_v20  ;;  %v1288_v63 = vpop.permute.xlu1 %1287 }
 0x326   : > { %v1986_v61 = vmul.f32 0.1, %v1923_v38  ;;  %v1696_v28 = vsel %vm1681_vm7, %v4058_v30, %v1288_v63  ;;  %v1448_v1 = vpop.permute.xlu0 %1447 }
 0x327   : > { %v1970_v43 = vmul.f32 0.1, %v1875_v59  ;;  %v1745_v39 = vsel %vm1714_vm8, %v1712_v12, %v1448_v1  ;;  %v1729_v33 = vsel %vm1714_vm8, %v1696_v28, %v1416_v51  ;;  %v1290_v29 = vpop.permute.xlu2 %1289 }
 0x328   : > { %v2018_v24 = vmax.f32 %v1923_v38, %v1986_v61  ;;  %2405 = vmatmul.msk.f32.gmra.mxu3 %vm1756_vm9, %v1745_v39  ;;  %v1697_v49 = vsel %vm1681_vm7, %v4055_v19, %v1290_v29 }
 0x329   : > { %v2002_v8 = vmax.f32 %v1875_v59, %v1970_v43  ;;  %2389 = vmatmul.msk.f32.gmra.mxu1 %vm1756_vm9, %v1729_v33 }
 0x32a   : > { %2066 = vxpose.xlu2.b32.start [1/16] (narrow) %v2018_v24, 8 }
 0x32b   : > { %2034 = vxpose.xlu1.b32.start [1/16] (narrow) %v2002_v8, 8 }
 0x32c   : > { %v1877_v27 = vpop.f32.mrf.mxu0 }
 0x32d   : > { %v1878_v56 = vadd.f32 %v4329_v15, %v1877_v27  ;;  %v1450_v16 = vpop.permute.xlu1 %1449 }
 0x32e   : > { %v1322_v14 = vpop.permute.xlu0 %1321 }
 0x32f   : > { %v1971_v30 = vmul.f32 0.1, %v1878_v56  ;;  %v1713_v0 = vsel %vm1681_vm7, %v4086_v57, %v1322_v14 }
 0x330   : > { %v1746_v9 = vsel %vm1714_vm8, %v1713_v0, %v1450_v16 }
 0x331   : > { %v2003_v44 = vmax.f32 %v1878_v56, %v1971_v30  ;;  %2406 = vmatmul.msk.f32.gmra.mxu3 %vm1756_vm9, %v1746_v9 }
 0x333   : > { %v1925_v32 = vpop.f32.mrf.mxu2  ;;  %2035 = vxpose.xlu1.b32.cont [2/16] (narrow) %v2003_v44, 8 }
 0x334   : > { %v1926_v17 = vadd.f32 %v4329_v15, %v1925_v32  ;;  %v1880_v36 = vpop.f32.mrf.mxu0 }
 0x335   : > { %v1881_v35 = vadd.f32 %v4329_v15, %v1880_v36 }
 0x336   : > { %v1987_v11 = vmul.f32 0.1, %v1926_v17  ;;  %v1418_v47 = vpop.permute.xlu0 %1417 }
 0x337   : > { %v1972_v50 = vmul.f32 0.1, %v1881_v35  ;;  %v1730_v57 = vsel %vm1714_vm8, %v1697_v49, %v1418_v47 }
 0x338   : > { %v2019_v21 = vmax.f32 %v1926_v17, %v1987_v11  ;;  %2390 = vmatmul.msk.f32.gmra.mxu1 %vm1756_vm9, %v1730_v57 }
 0x339   : > { %v2004_v5 = vmax.f32 %v1881_v35, %v1972_v50 }
 0x33a   : > { %2067 = vxpose.xlu2.b32.cont [2/16] (narrow) %v2019_v21, 8 }
 0x33b   : > { %v1928_v55 = vpop.f32.mrf.mxu2  ;;  %2036 = vxpose.xlu1.b32.cont [3/16] (narrow) %v2004_v5, 8 }
 0x33c   : > { %v1929_v7 = vadd.f32 %v4329_v15, %v1928_v55 }
 0x33e   : > { %v1988_v62 = vmul.f32 0.1, %v1929_v7 }
 0x340   : > { %v2020_v4 = vmax.f32 %v1929_v7, %v1988_v62 }
 0x342   : > { %2068 = vxpose.xlu2.b32.cont [3/16] (narrow) %v2020_v4, 8 }
 0x343   : > { %v1931_v54 = vpop.f32.mrf.mxu2 }
 0x344   : > { %v1932_v19 = vadd.f32 %v4329_v15, %v1931_v54  ;;  %v1883_v41 = vpop.f32.mrf.mxu0  ;;  %v1946_v8 = vpop.f32.mrf.mxu3 }
 0x345   : > { %v1884_v60 = vadd.f32 %v4329_v15, %v1883_v41  ;;  %v1947_v0 = vadd.f32 %v4329_v15, %v1946_v8 }
 0x346   : > { %v1989_v40 = vmul.f32 0.1, %v1932_v19  ;;  %v1898_v28 = vpop.f32.mrf.mxu1 }
 0x347   : > { %v1973_v18 = vmul.f32 0.1, %v1884_v60  ;;  %v1899_v33 = vadd.f32 %v4329_v15, %v1898_v28  ;;  %v1994_v36 = vmul.f32 0.1, %v1947_v0 }
 0x348   : > { %v2021_v2 = vmax.f32 %v1932_v19, %v1989_v40 }
 0x349   : > { %v2005_v34 = vmax.f32 %v1884_v60, %v1973_v18  ;;  %v1978_v16 = vmul.f32 0.1, %v1899_v33  ;;  %v2026_v49 = vmax.f32 %v1947_v0, %v1994_v36 }
 0x34a   : > { %2069 = vxpose.xlu2.b32.cont [4/16] (narrow) %v2021_v2, 8 }
 0x34b   : > { %2037 = vxpose.xlu1.b32.cont [4/16] (narrow) %v2005_v34, 8  ;;  %v2010_v9 = vmax.f32 %v1899_v33, %v1978_v16 }
 0x34c   : > { %v1886_v48 = vpop.f32.mrf.mxu0 }
 0x34d   : > { %v1887_v46 = vadd.f32 %v4329_v15, %v1886_v48 }
 0x34f   : > { %v1974_v37 = vmul.f32 0.1, %v1887_v46 }
 0x351   : > { %v2006_v25 = vmax.f32 %v1887_v46, %v1974_v37 }
 0x353   : > { %2038 = vxpose.xlu1.b32.cont [5/16] (narrow) %v2006_v25, 8 }
 0x354   : > { %v1934_v3 = vpop.f32.mrf.mxu2 }
 0x355   : > { %v1935_v26 = vadd.f32 %v4329_v15, %v1934_v3 }
 0x357   : > { %v1990_v22 = vmul.f32 0.1, %v1935_v26 }
 0x359   : > { %v2022_v45 = vmax.f32 %v1935_v26, %v1990_v22 }
 0x35b   : > { %2070 = vxpose.xlu2.b32.cont [5/16] (narrow) %v2022_v45, 8  ;;  %v1949_v32 = vpop.f32.mrf.mxu3 }
 0x35c   : > { %v1950_v11 = vadd.f32 %v4329_v15, %v1949_v32 }
 0x35d   : > { %v1901_v27 = vpop.f32.mrf.mxu1 }
 0x35e   : > { %v1902_v44 = vadd.f32 %v4329_v15, %v1901_v27  ;;  %v1995_v5 = vmul.f32 0.1, %v1950_v11 }
 0x360   : > { %v1979_v35 = vmul.f32 0.1, %v1902_v44  ;;  %v2027_v7 = vmax.f32 %v1950_v11, %v1995_v5 }
 0x362   : > { %v2011_v47 = vmax.f32 %v1902_v44, %v1979_v35 }
 0x36a   : > { %v1952_v57 = vpop.f32.mrf.mxu3 }
 0x36b   : > { %v1937_v23 = vpop.f32.mrf.mxu2  ;;  %v1953_v62 = vadd.f32 %v4329_v15, %v1952_v57 }
 0x36c   : > { %v1938_v53 = vadd.f32 %v4329_v15, %v1937_v23  ;;  %v1904_v17 = vpop.f32.mrf.mxu1 }
 0x36d   : > { %v1889_v10 = vpop.f32.mrf.mxu0  ;;  %v1905_v50 = vadd.f32 %v4329_v15, %v1904_v17  ;;  %v1996_v60 = vmul.f32 0.1, %v1953_v62 }
 0x36e   : > { %v1991_v42 = vmul.f32 0.1, %v1938_v53  ;;  %v1890_v6 = vadd.f32 %v4329_v15, %v1889_v10 }
 0x36f   : > { %v1980_v55 = vmul.f32 0.1, %v1905_v50  ;;  %v2028_v18 = vmax.f32 %v1953_v62, %v1996_v60 }
 0x370   : > { %v2023_v52 = vmax.f32 %v1938_v53, %v1991_v42  ;;  %v1975_v58 = vmul.f32 0.1, %v1890_v6 }
 0x371   : > { %v2012_v4 = vmax.f32 %v1905_v50, %v1980_v55 }
 0x372   : > { %v2007_v13 = vmax.f32 %v1890_v6, %v1975_v58  ;;  %2071 = vxpose.xlu2.b32.cont [6/16] (narrow) %v2023_v52, 8 }
 0x374   : > { %2039 = vxpose.xlu1.b32.cont [6/16] (narrow) %v2007_v13, 8 }
 0x37a   : > { %v1940_v31 = vpop.f32.mrf.mxu2 }
 0x37b   : > { %v1941_v38 = vadd.f32 %v4329_v15, %v1940_v31 }
 0x37c   : > { %v1892_v20 = vpop.f32.mrf.mxu0  ;;  %v1955_v19 = vpop.f32.mrf.mxu3 }
 0x37d   : > { %v1992_v59 = vmul.f32 0.1, %v1941_v38  ;;  %v1893_v63 = vadd.f32 %v4329_v15, %v1892_v20  ;;  %v1956_v2 = vadd.f32 %v4329_v15, %v1955_v19 }
 0x37e   : > { %v1907_v21 = vpop.f32.mrf.mxu1 }
 0x37f   : > { %v2024_v12 = vmax.f32 %v1941_v38, %v1992_v59  ;;  %v1976_v51 = vmul.f32 0.1, %v1893_v63  ;;  %v1908_v54 = vadd.f32 %v4329_v15, %v1907_v21  ;;  %v1997_v25 = vmul.f32 0.1, %v1956_v2 }
 0x381   : > { %v2008_v61 = vmax.f32 %v1893_v63, %v1976_v51  ;;  %2072 = vxpose.xlu2.b32.cont [7/16] (narrow) %v2024_v12, 8  ;;  %v1981_v40 = vmul.f32 0.1, %v1908_v54  ;;  %v2029_v26 = vmax.f32 %v1956_v2, %v1997_v25 }
 0x383   : > { %2040 = vxpose.xlu1.b32.cont [7/16] (narrow) %v2008_v61, 8  ;;  %v2013_v34 = vmax.f32 %v1908_v54, %v1981_v40 }
 0x384   : > { %v1895_v1 = vpop.f32.mrf.mxu0 }
 0x385   : > { %v1896_v43 = vadd.f32 %v4329_v15, %v1895_v1 }
 0x387   : > { %v1977_v39 = vmul.f32 0.1, %v1896_v43 }
 0x389   : > { %v2009_v24 = vmax.f32 %v1896_v43, %v1977_v39 }
 0x38b   : > { %2041 = vxpose.xlu1.b32.cont [8/16] (narrow) %v2009_v24, 8 }
 0x38c   : > { %v1943_v56 = vpop.f32.mrf.mxu2 }
 0x38d   : > { %v1944_v14 = vadd.f32 %v4329_v15, %v1943_v56 }
 0x38f   : > { %v1993_v30 = vmul.f32 0.1, %v1944_v14 }
 0x391   : > { %v2025_v29 = vmax.f32 %v1944_v14, %v1993_v30 }
 0x393   : > { %2073 = vxpose.xlu2.b32.cont [8/16] (narrow) %v2025_v29, 8  ;;  %2042 = vxpose.xlu1.b32.cont [9/16] (narrow) %v2010_v9, 8  ;;  %v1958_v46 = vpop.f32.mrf.mxu3 }
 0x394   : > { %v1959_v22 = vadd.f32 %v4329_v15, %v1958_v46 }
 0x395   : > { %v1910_v41 = vpop.f32.mrf.mxu1 }
 0x396   : > { %v1911_v48 = vadd.f32 %v4329_v15, %v1910_v41  ;;  %v1998_v10 = vmul.f32 0.1, %v1959_v22 }
 0x398   : > { %v1982_v3 = vmul.f32 0.1, %v1911_v48  ;;  %v2030_v52 = vmax.f32 %v1959_v22, %v1998_v10 }
 0x39a   : > { %v2014_v45 = vmax.f32 %v1911_v48, %v1982_v3 }
 0x39b   : > { %2074 = vxpose.xlu2.b32.cont [9/16] (narrow) %v2026_v49, 8  ;;  %2043 = vxpose.xlu1.b32.cont [10/16] (narrow) %v2011_v47, 8  ;;  %v1961_v53 = vpop.f32.mrf.mxu3 }
 0x39c   : > { %v1962_v58 = vadd.f32 %v4329_v15, %v1961_v53 }
 0x39e   : > { %v1913_v37 = vpop.f32.mrf.mxu1  ;;  %v1999_v20 = vmul.f32 0.1, %v1962_v58 }
 0x39f   : > { %v1914_v23 = vadd.f32 %v4329_v15, %v1913_v37 }
 0x3a0   : > { %v2031_v12 = vmax.f32 %v1962_v58, %v1999_v20 }
 0x3a1   : > { %v1983_v42 = vmul.f32 0.1, %v1914_v23 }
 0x3a3   : > { %2075 = vxpose.xlu2.b32.cont [10/16] (narrow) %v2027_v7, 8  ;;  %2044 = vxpose.xlu1.b32.cont [11/16] (narrow) %v2012_v4, 8  ;;  %v2015_v13 = vmax.f32 %v1914_v23, %v1983_v42 }
 0x3a6   : > { %v1916_v6 = vpop.f32.mrf.mxu1 }
 0x3a7   : > { %v1917_v31 = vadd.f32 %v4329_v15, %v1916_v6 }
 0x3a9   : > { %v1984_v59 = vmul.f32 0.1, %v1917_v31 }
 0x3ab   : > { %2076 = vxpose.xlu2.b32.cont [11/16] (narrow) %v2028_v18, 8  ;;  %2045 = vxpose.xlu1.b32.cont [12/16] (narrow) %v2013_v34, 8  ;;  %v1964_v38 = vpop.f32.mrf.mxu3  ;;  %v2016_v51 = vmax.f32 %v1917_v31, %v1984_v59 }
 0x3ac   : > { %v1965_v61 = vadd.f32 %v4329_v15, %v1964_v38 }
 0x3ae   : > { %v2000_v1 = vmul.f32 0.1, %v1965_v61 }
 0x3b0   : > { %v2032_v33 = vmax.f32 %v1965_v61, %v2000_v1 }
 0x3b3   : > { %2077 = vxpose.xlu2.b32.cont [12/16] (narrow) %v2029_v26, 8  ;;  %2046 = vxpose.xlu1.b32.cont [13/16] (narrow) %v2014_v45, 8 }
 0x3b4   : > { %v1967_v39 = vpop.f32.mrf.mxu3 }
 0x3b5   : > { %v1919_v63 = vpop.f32.mrf.mxu1  ;;  %v1968_v24 = vadd.f32 %v4329_v15, %v1967_v39 }
 0x3b6   : > { %v1920_v28 = vadd.f32 %v4329_v15, %v1919_v63 }
 0x3b7   : > { %v2001_v27 = vmul.f32 0.1, %v1968_v24 }
 0x3b8   : > { %v1985_v43 = vmul.f32 0.1, %v1920_v28 }
 0x3b9   : > { %v2033_v56 = vmax.f32 %v1968_v24, %v2001_v27 }
 0x3ba   : > { %v2017_v8 = vmax.f32 %v1920_v28, %v1985_v43 }
 0x3bb   : > { %2078 = vxpose.xlu2.b32.cont [13/16] (narrow) %v2030_v52, 8  ;;  %2047 = vxpose.xlu1.b32.cont [14/16] (narrow) %v2015_v13, 8 }
 0x3c3   : > { %2079 = vxpose.xlu2.b32.cont [14/16] (narrow) %v2031_v12, 8  ;;  %2048 = vxpose.xlu1.b32.cont [15/16] (narrow) %v2016_v51, 8 }
 0x3cb   : > { %2080 = vxpose.xlu2.b32.cont [15/16] (narrow) %v2032_v33, 8  ;;  %2049 = vxpose.xlu1.b32.end [16/16] (narrow) %v2017_v8, 8 }
 0x3d3   : > { %2081 = vxpose.xlu2.b32.end [16/16] (narrow) %v2033_v56, 8 }
 0x3f4   : > { %v2082_v16 = vpop.trf.xlu2 }
 0x3f5   : > { %2099 = vst [vmem:[%s163_s10 + $0x8] sm:$0xff] %v2082_v16 }
 0x3f7   : > { %v2050_v15 = vpop.trf.xlu1 }
 0x3f8   : > { %2098 = vst [vmem:[%s163_s10] sm:$0xff] %v2050_v15 }
 0x3f9   : > { %2509 = shalt.err (!%p2506_p3)
}
 0x3fa   : > { %2429 = dma.vmem_to_hbm [thread:$0]  (%p2612_p5), %s2115_s11, 256, %s2117_s17, %s2101_s19  }
 0x3fb PF: > { %p2435_p4 = scmp.ge.s32.totalorder %s2544_s15, 2  ;;  %s2128_s28 = sand.u32 1, %s2532_s12  }
 0x3fc   : > { %s2129_s30 = scalar_lea.sflag [#allocation3], %s2128_s28 }
 0x3fd   : > { %p2432_p7 = pnand %p2435_p4, %p2616_p6 }
 0x3ff   : > { %p2433_p8 = pneg %p2432_p7 }
 0x401   : > { %2527 = dma.done.wait (%p2433_p8), %s2129_s30, 256  }
 0x402   : > { %2529 = vsyncadd (%p2433_p8), %s2129_s30, 4294967040  ;;  %p13_p9 = scmp.ge.s32.totalorder %s2599_s18, 4   ;;  %s4731_s12 = smov %s2536_s13 }
 0x403   : > { %s4732_s13 = smov %s2540_s14  ;;  %s4733_s14 = smov %s2610_s21 }
 0x404   : > { %s4734_s15 = smov %s2599_s18  ;;  %15 = sbr.rel (!%p13_p9) target bundleno = 3 (0x3), region = 69 }
 0x409   :  { %2135 = vsyncpa [#allocation3], 1 }
 0x40a   :  { %2137 = vsyncpa [#allocation3 + $0x1], 1 }

</bundles_post_ra>
